<compile_context>
chip_gen: v7x
topology: tpu7x:2x2x1
jax: 0.10.0
libtpu: 0.0.40
codegen_flags: <defaults>
</compile_context>

<pallas_src>
import functools
import math

import numpy as np
import jax
import jax.numpy as jnp
from jax import lax
from jax.experimental import pallas as pl
from jax.experimental.pallas import tpu as pltpu


# ---------------------------------------------------------------------------
# Probe: does this Pallas/Mosaic build support lane-dim strided ds slicing?
# ---------------------------------------------------------------------------
_STRIDED_PROBE = {"ok": None}


def _strided_slicing_supported():
    """Compile + run a tiny kernel using strided pl.ds loads/stores and verify
    the numerics.  Any failure (lowering or semantics) -> use the fallback."""
    if _STRIDED_PROBE["ok"] is not None:
        return _STRIDED_PROBE["ok"]
    ok = False
    try:
        def probe_kernel(x_ref, o_ref, scr):
            scr[1, 0:16, 0:16] = x_ref[...]
            scr[0, 0:16, 0:16] = jnp.zeros((16, 16), jnp.float32)
            v = scr[1, 0:16, pl.ds(1, 8, stride=2)]          # strided lane read
            scr[0, 0:3, pl.ds(0, 8, stride=2)] = v[0:3, :]   # strided lane store
            v2 = scr[1, 0:4, pl.ds(0, 8, stride=2)]
            scr[0, 8:12, 0:8] = v2
            o_ref[...] = scr[0, 0:16, 0:16]

        x = jnp.arange(16 * 16, dtype=jnp.float32).reshape(16, 16)
        out = pl.pallas_call(
            probe_kernel,
            out_shape=jax.ShapeDtypeStruct((16, 16), jnp.float32),
            scratch_shapes=[pltpu.VMEM((2, 16, 16), jnp.float32)],
        )(x)
        out = np.asarray(jax.block_until_ready(out))
        xe = np.arange(16 * 16, dtype=np.float32).reshape(16, 16)
        exp = np.zeros((16, 16), np.float32)
        exp[0:3, 0:16:2] = xe[0:3, 1:16:2]
        exp[8:12, 0:8] = xe[0:4, 0:16:2]
        ok = bool(np.allclose(out, exp))
    except Exception:
        ok = False
    _STRIDED_PROBE["ok"] = ok
    return ok


# ---------------------------------------------------------------------------
# Trace-time plan/slab builder (pure JAX, runs under jit tracing)
# ---------------------------------------------------------------------------
def _build_plan_and_slab(params, kernel_size, superpixel_rate, l0):
    """Flatten / permute all torch-layout weights into one parameter slab and a
    static per-layer plan.

    Slab (f32, shape (R, max_w + 1)):
      * weight rows: cols [0:width) = tap-major flattened weights
        W[o, t*C_in + c]; col max_w = conv bias for that row.
      * one extra row per PReLU holding its scalar slope at col 0.

    Channel bookkeeping: superpixel/subpixel channel interleaves are absorbed
    into input-channel permutations / output-row regrouping of the weights, so
    the kernel never has to permute channels.
    """
    kernel_size = list(kernel_size)
    conv_kernel_size = int(params["final_w"].shape[2])
    r = superpixel_rate
    k_max = max(max(kernel_size), conv_kernel_size)
    assert k_max % 2 == 1 and all(k % 2 == 1 for k in kernel_size)

    w_blocks = []          # list of (w_flat (nr, wdt), bias (nr,))
    row_ptr = 0
    max_w = 0
    alpha_vals = []
    plan = []

    def flatten(w, b, perm):
        w = jnp.asarray(w, jnp.float32)[:, jnp.asarray(perm, jnp.int32), :]
        c_b, c_in, k = w.shape
        wf = jnp.transpose(w, (0, 2, 1)).reshape(c_b, k * c_in)
        return wf, jnp.asarray(b, jnp.float32).reshape(c_b)

    def add_rows(wf, bias):
        nonlocal row_ptr, max_w
        nr, wdt = wf.shape
        w_blocks.append((wf, bias))
        r0 = row_ptr
        row_ptr += nr
        max_w = max(max_w, wdt)
        return r0, nr, wdt

    perm = [0]          # internal channel i holds torch channel perm[i]
    c_in = 1
    length = l0

    # ---- encoder: MultiscaleConv -> PReLU -> Superpixel ----
    for blk in params["enc"]:
        branches, parts = [], []
        c_out = 0
        for bi, ((w, b), k) in enumerate(zip(blk["convs"], kernel_size)):
            assert w.shape[1] == c_in and w.shape[2] == k
            branches.append((k, (k_max - k) // 2))
            wf, bias = flatten(w, b, perm)
            r0, nr, wdt = add_rows(wf, bias)
            parts.append((r0, nr, bi, wdt))
            c_out += nr
        alpha_vals.append(jnp.asarray(blk["alpha"], jnp.float32).reshape(()))
        lq = -(-length // r)
        r_pad = lq * r - length
        if r_pad:
            assert length >= r_pad + 1, "torch reflect pad needs length > pad"
        plan.append(dict(L=length, C_in=c_in, branches=tuple(branches),
                         groups=(tuple(parts),), act=len(alpha_vals) - 1,
                         resample=("super", r, c_out, lq)))
        # superpixel: next internal channel j*c_out + c holds torch c*r + j
        perm = [(i % c_out) * r + (i // c_out) for i in range(c_out * r)]
        c_in = c_out * r
        length = lq

    # ---- decoder: MultiscaleConv -> Dropout(eval: identity) -> PReLU -> Subpixel
    for blk in params["dec"]:
        branches, wfs = [], []
        c_per = None
        for bi, ((w, b), k) in enumerate(zip(blk["convs"], kernel_size)):
            assert w.shape[1] == c_in and w.shape[2] == k
            branches.append((k, (k_max - k) // 2))
            wf, bias = flatten(w, b, perm)
            wfs.append((wf, bias))
            c_per = wf.shape[0]
        c_out = c_per * len(wfs)
        assert c_per % r == 0
        groups = []
        for j in range(r):            # output group j = torch channels {p*r + j}
            parts = []
            for bi, (wf, bias) in enumerate(wfs):
                r0, nr, wdt = add_rows(wf[j::r], bias[j::r])
                parts.append((r0, nr, bi, wdt))
            groups.append(tuple(parts))
        alpha_vals.append(jnp.asarray(blk["alpha"], jnp.float32).reshape(()))
        plan.append(dict(L=length, C_in=c_in, branches=tuple(branches),
                         groups=tuple(groups), act=len(alpha_vals) - 1,
                         resample=("sub", r, c_out, length * r)))
        perm = list(range(c_out // r))    # subpixel output is in torch order
        c_in = c_out // r
        length = length * r

    # ---- final Conv1d ----
    w, b = params["final_w"], params["final_b"]
    assert w.shape[1] == c_in and w.shape[2] == conv_kernel_size
    wf, bias = flatten(w, b, perm)
    r0, nr, wdt = add_rows(wf, bias)
    plan.append(dict(L=length, C_in=c_in,
                     branches=((conv_kernel_size,
                                (k_max - conv_kernel_size) // 2),),
                     groups=(((r0, nr, 0, wdt),),), act=None,
                     resample=("out",)))

    # ---- assemble the slab ----
    n_w_rows = row_ptr
    slab_rows = []
    for wf, bias in w_blocks:
        nr, wdt = wf.shape
        fill = jnp.zeros((nr, max_w - wdt), jnp.float32)
        slab_rows.append(jnp.concatenate([wf, fill, bias.reshape(nr, 1)], axis=1))
    for a in alpha_vals:
        slab_rows.append(jnp.concatenate(
            [a.reshape(1, 1), jnp.zeros((1, max_w), jnp.float32)], axis=1))
    slab = jnp.concatenate(slab_rows, axis=0)

    plan2 = []
    for spec in plan:
        spec = dict(spec)
        if spec["act"] is not None:
            spec["act"] = n_w_rows + spec["act"]    # absolute slab row of alpha
        plan2.append(spec)

    return tuple(plan2), slab, k_max, max_w


# ---------------------------------------------------------------------------
# Fully fused forward kernel (B_TILE batch elements per grid step)
# ---------------------------------------------------------------------------
def _fused_forward_kernel(x_ref, slab_ref, o_ref, pad_scr, shuf_scr, *,
                          plan, b_tile, k_max, bias_col, use_strided):
    pad = (k_max - 1) // 2
    B = b_tile
    f32 = jnp.float32

    # scatter the raw input rows into the layer-0 zero-haloed scratch
    L0 = plan[0]["L"]
    xa = x_ref[0]                                       # (1, B*L0)
    for b in range(B):
        pad_scr[b, 0:1, pad:pad + L0] = xa[:, b * L0:(b + 1) * L0]

    for spec in plan:
        L, c_in = spec["L"], spec["C_in"]
        if pad > 0:                                     # zero the halo columns
            halo = jnp.zeros((c_in, pad), f32)
            for b in range(B):
                pad_scr[b, 0:c_in, 0:pad] = halo
                pad_scr[b, 0:c_in, pad + L:pad + L + pad] = halo

        # im2col per multiscale branch: (k*C_in, B*L), tap-major rows,
        # batch folded into the lane (N) dimension of the matmul.
        imcols = []
        for (k, off) in spec["branches"]:
            segs = []
            for b in range(B):
                taps = [pad_scr[b, 0:c_in, pl.ds(off + t, L)] for t in range(k)]
                segs.append(jnp.concatenate(taps, axis=0))
            imcols.append(jnp.concatenate(segs, axis=1))

        alpha = None
        if spec["act"] is not None:
            arow = spec["act"]
            alpha = slab_ref[arow:arow + 1, 0:1]        # (1, 1) -> broadcasts

        # one MXU matmul per (output-group, branch); bias read from the slab
        ys = []
        for grp in spec["groups"]:
            outs = []
            for (r0, nr, bi, wdt) in grp:
                w = slab_ref[r0:r0 + nr, 0:wdt]
                bias = slab_ref[r0:r0 + nr, bias_col:bias_col + 1]
                outs.append(jnp.dot(w, imcols[bi], preferred_element_type=f32)
                            + bias)
            y = jnp.concatenate(outs, axis=0)
            if alpha is not None:                       # PReLU (scalar slope)
                y = jnp.where(y >= 0.0, y, alpha * y)
            ys.append(y)
        # TODO(synk): Dropout is identity (eval mode); train-mode masking not implemented.

        res = spec["resample"]
        if res[0] == "super":
            _, rr, c_out, lq = res
            r_pad = lq * rr - L
            if use_strided:
                for b in range(B):
                    shuf_scr[b, 0:c_out, 0:L] = ys[0][:, b * L:(b + 1) * L]
                    for m in range(r_pad):              # torch 'reflect' right pad
                        shuf_scr[b, 0:c_out, L + m:L + m + 1] = \
                            shuf_scr[b, 0:c_out, L - 2 - m:L - 1 - m]
                    for j in range(rr):
                        part = shuf_scr[b, 0:c_out, pl.ds(j, lq, stride=rr)]
                        pad_scr[b, j * c_out:(j + 1) * c_out, pad:pad + lq] = part
            else:
                rows = lax.broadcasted_iota(jnp.int32, (L, lq), 0)
                cols = lax.broadcasted_iota(jnp.int32, (L, lq), 1)
                for j in range(rr):
                    src = cols * rr + j
                    src = jnp.where(src >= L, 2 * L - 2 - src, src)
                    dj = (rows == src).astype(f32)
                    for b in range(B):
                        part = jnp.dot(ys[0][:, b * L:(b + 1) * L], dj,
                                       preferred_element_type=f32)
                        pad_scr[b, j * c_out:(j + 1) * c_out, pad:pad + lq] = part
        elif res[0] == "sub":
            _, rr, c_out, l_next = res
            cp = c_out // rr
            if use_strided:
                for j in range(rr):
                    yj = ys[j]
                    for b in range(B):
                        pad_scr[b, 0:cp, pl.ds(pad + j, L, stride=rr)] = \
                            yj[:, b * L:(b + 1) * L]
            else:
                qrows = lax.broadcasted_iota(jnp.int32, (L, l_next), 0)
                qcols = lax.broadcasted_iota(jnp.int32, (L, l_next), 1)
                sjs = [(qcols == qrows * rr + j).astype(f32) for j in range(rr)]
                for b in range(B):
                    acc = None
                    for j in range(rr):
                        v = jnp.dot(ys[j][:, b * L:(b + 1) * L], sjs[j],
                                    preferred_element_type=f32)
                        acc = v if acc is None else acc + v
                    pad_scr[b, 0:cp, pad:pad + l_next] = acc
        else:                                           # final conv -> output
            o_ref[0] = ys[0]


# ---------------------------------------------------------------------------
# Fused forward wrapper
# ---------------------------------------------------------------------------
def autoencoder_forward(x, params, *, kernel_size, superpixel_rate,
                        b_tile=None, use_strided=None):
    """x: (N, L) -> (N, L)  (matches Autoencoder.forward, eval mode)."""
    n, l0 = x.shape
    r = superpixel_rate
    if use_strided is None:
        use_strided = _strided_slicing_supported()

    plan, slab, k_max, max_w = _build_plan_and_slab(params, kernel_size, r, l0)
    pad = (k_max - 1) // 2
    l_final = plan[-1]["L"]

    # batch tiling: fold b_tile elements into the lane dim; keep grid >= 2
    if b_tile is None:
        b_tile = max(1, 256 // max(l0, 1))
        if n >= 2:
            b_tile = min(b_tile, max(1, n // 2))
    b_tile = max(1, min(int(b_tile), n))
    g = -(-n // b_tile)
    n_pad = g * b_tile
    x_p = x.astype(jnp.float32)
    if n_pad != n:
        x_p = jnp.concatenate([x_p, jnp.zeros((n_pad - n, l0), jnp.float32)], 0)
    x3 = x_p.reshape(g, 1, b_tile * l0)

    # scratch sizing
    c_s, l_max = 1, 1
    for spec in plan:
        res = spec["resample"]
        c_out = res[2] if len(res) > 2 else 1
        l_nxt = res[3] if len(res) > 3 else spec["L"]
        c_s = max(c_s, spec["C_in"], c_out)
        l_max = max(l_max, spec["L"], l_nxt)
    w_scr = l_max + max(2 * pad, r)

    est_bytes = 4 * (2 * b_tile * c_s * w_scr
                     + 2 * b_tile * l0 + 2 * b_tile * l_final
                     + 2 * slab.shape[0] * slab.shape[1])
    vmem_limit = int(min(max(32 * 1024 * 1024, 3 * est_bytes), 48 * 1024 * 1024))

    kernel = functools.partial(
        _fused_forward_kernel, plan=plan, b_tile=b_tile, k_max=k_max,
        bias_col=max_w, use_strided=bool(use_strided))

    out = pl.pallas_call(
        kernel,
        out_shape=jax.ShapeDtypeStruct((g, 1, b_tile * l_final), jnp.float32),
        grid=(g,),
        in_specs=[
            pl.BlockSpec((1, 1, b_tile * l0), lambda i: (i, 0, 0)),
            pl.BlockSpec(slab.shape, lambda i: (0, 0)),      # single param slab
        ],
        out_specs=pl.BlockSpec((1, 1, b_tile * l_final), lambda i: (i, 0, 0)),
        scratch_shapes=[
            pltpu.VMEM((b_tile, c_s, w_scr), jnp.float32),   # padded activations
            pltpu.VMEM((b_tile, c_s, w_scr), jnp.float32),   # superpixel staging
        ],
        compiler_params=pltpu.CompilerParams(
            dimension_semantics=("parallel",),
            vmem_limit_bytes=vmem_limit),
    )(x3, slab)

    y = out.reshape(g * b_tile, l_final)
    return y[:n, :l0]                                   # [:, :orig_size]


# ---------------------------------------------------------------------------
# Deterministic parameter init (matches the torch module's shapes)
# ---------------------------------------------------------------------------
def _init_conv_branch(key, c_in, c_out, k):
    kw, kb = jax.random.split(key)
    bound = 1.0 / math.sqrt(c_in * k)
    w = jax.random.uniform(kw, (c_out, c_in, k), jnp.float32, -bound, bound)
    b = jax.random.uniform(kb, (c_out,), jnp.float32, -bound, bound)
    return w, b


def _init_multiscale(key, c_in, c_out_total, kernel_size):
    n_k = len(kernel_size)
    assert c_out_total % n_k == 0
    c_per = c_out_total // n_k
    keys = jax.random.split(key, n_k)
    return [_init_conv_branch(keys[i], c_in, c_per, k)
            for i, k in enumerate(kernel_size)]


def init_autoencoder_params(key, out_channel, kernel_size, conv_in_channel,
                            conv_kernel_size, superpixel_rate):
    params = {"enc": [], "dec": []}
    in_chs = [1] + list(out_channel)
    for block_i, (in_c, out_c) in enumerate(zip(in_chs, out_channel)):
        c_in = in_c if block_i == 0 else in_c * superpixel_rate
        key, sub = jax.random.split(key)
        params["enc"].append({"convs": _init_multiscale(sub, c_in, out_c, kernel_size),
                              "alpha": jnp.float32(0.2)})       # PReLU(init=0.2)
    rev_in = list(out_channel[::-1])
    rev_out = list(out_channel[-2::-1]) + [conv_in_channel]
    for block_i, (in_c, out_c) in enumerate(zip(rev_in, rev_out)):
        assert out_c % (len(kernel_size) * superpixel_rate) == 0
        c_in = in_c * superpixel_rate if block_i == 0 else in_c // superpixel_rate
        key, sub = jax.random.split(key)
        params["dec"].append({"convs": _init_multiscale(sub, c_in, out_c, kernel_size),
                              "alpha": jnp.float32(0.2)})
    c_in_f = conv_in_channel // superpixel_rate
    key, kw2, kb2 = jax.random.split(key, 3)
    bound = 1.0 / math.sqrt(c_in_f * conv_kernel_size)
    params["final_w"] = jax.random.uniform(kw2, (1, c_in_f, conv_kernel_size),
                                           jnp.float32, -bound, bound)
    params["final_b"] = jax.random.uniform(kb2, (1,), jnp.float32, -bound, bound)
    return params


# ---------------------------------------------------------------------------
# Pure-JAX reference (mirrors the torch forward exactly; for correctness check)
# ---------------------------------------------------------------------------
def _ref_conv1d(x, w, b):
    c_out, c_in, k = w.shape
    n, _, l = x.shape
    pad = (k - 1) // 2
    xp = jnp.pad(x, ((0, 0), (0, 0), (pad, pad)))
    out = jnp.zeros((n, c_out, l), jnp.float32)
    for t in range(k):
        out = out + jnp.einsum("oi,nil->nol", w[:, :, t], xp[:, :, t:t + l],
                               precision=jax.lax.Precision.HIGHEST)
    return out + b[None, :, None]


def _ref_multiscale(x, convs):
    return jnp.concatenate([_ref_conv1d(x, w, b) for w, b in convs], axis=1)


def _ref_superpixel(x, r):
    n, c, l = x.shape
    r_pad = (r - l % r) % r
    if r_pad:
        x = jnp.pad(x, ((0, 0), (0, 0), (0, r_pad)), mode="reflect")
    l2 = x.shape[-1]
    return x.reshape(n, c, l2 // r, r).transpose(0, 1, 3, 2).reshape(n, c * r, l2 // r)


def _ref_subpixel(x, r):
    n, c, l = x.shape
    return x.reshape(n, c // r, r, l).transpose(0, 1, 3, 2).reshape(n, c // r, l * r)


def _ref_forward(x, params, superpixel_rate):
    r = superpixel_rate
    orig = x.shape[-1]
    h = x[:, None, :]
    for blk in params["enc"]:
        y = _ref_multiscale(h, blk["convs"])
        y = jnp.where(y >= 0, y, blk["alpha"] * y)       # PReLU (scalar)
        h = _ref_superpixel(y, r)
    for blk in params["dec"]:
        y = _ref_multiscale(h, blk["convs"])             # dropout: identity (eval)
        y = jnp.where(y >= 0, y, blk["alpha"] * y)
        h = _ref_subpixel(y, r)
    y = _ref_conv1d(h, params["final_w"], params["final_b"])[:, 0, :]
    return y[:, :orig]


# ---------------------------------------------------------------------------
if __name__ == "__main__":
    key = jax.random.PRNGKey(0)
    key, kp, kx = jax.random.split(key, 3)

    # Small config satisfying the PyTorch module's asserts.
    input_length = 16
    out_channel = [4, 8]
    kernel_size = [3, 5]
    conv_in_channel = 4
    conv_kernel_size = 3
    superpixel_rate = 2
    # dropout_p = 0.1  -> eval mode => identity

    params = init_autoencoder_params(kp, out_channel, kernel_size,
                                     conv_in_channel, conv_kernel_size,
                                     superpixel_rate)

    n = 4
    x = jax.random.normal(kx, (n, input_length), dtype=jnp.float32)

    use_strided = _strided_slicing_supported()           # probe outside of jit

    fwd = jax.jit(functools.partial(
        autoencoder_forward, kernel_size=tuple(kernel_size),
        superpixel_rate=superpixel_rate, b_tile=2, use_strided=use_strided))
    y = jax.block_until_ready(fwd(x, params))
    assert y.shape == (n, input_length), y.shape

    y_ref = _ref_forward(x, params, superpixel_rate)
    err = float(jnp.max(jnp.abs(y - y_ref)))
    assert err < 1e-3, ("max abs err", err)

    print("KERNEL_OK")
</pallas_src>

<mosaic_0001>
module attributes {stable_mosaic.version = 11 : i64} {
  func.func @probe_kernel(%arg0: memref<16x16xf32, #tpu.memory_space<vmem>>, %arg1: memref<16x16xf32, #tpu.memory_space<vmem>>, %arg2: memref<2x16x16xf32, #tpu.memory_space<vmem>>) attributes {dimension_semantics = [], scalar_prefetch = 0 : i64, scratch_operands = 1 : i64, tpu.core_type = #tpu.core_type<tc>} {
    %c0 = arith.constant 0 : index
    %c0_0 = arith.constant 0 : index
    %0 = vector.load %arg0[%c0, %c0_0] : memref<16x16xf32, #tpu.memory_space<vmem>>, vector<16x16xf32>
    %c1 = arith.constant 1 : index
    %c0_1 = arith.constant 0 : index
    %c0_2 = arith.constant 0 : index
    %1 = vector.load %arg2[%c1, %c0_1, %c0_2] : memref<2x16x16xf32, #tpu.memory_space<vmem>>, vector<1x16x16xf32>
    %2 = vector.shape_cast %1 : vector<1x16x16xf32> to vector<16x16xf32>
    %3 = vector.shape_cast %0 : vector<16x16xf32> to vector<1x16x16xf32>
    tpu.vector_store %arg2[%c1, %c0_1, %c0_2], %3 {strides = array<i32>} : memref<2x16x16xf32, #tpu.memory_space<vmem>>, vector<1x16x16xf32>,
    %cst = arith.constant 0.000000e+00 : f32
    %4 = vector.broadcast %cst : f32 to vector<16x16xf32>
    %c0_3 = arith.constant 0 : index
    %c0_4 = arith.constant 0 : index
    %c0_5 = arith.constant 0 : index
    %5 = vector.load %arg2[%c0_3, %c0_4, %c0_5] : memref<2x16x16xf32, #tpu.memory_space<vmem>>, vector<1x16x16xf32>
    %6 = vector.shape_cast %5 : vector<1x16x16xf32> to vector<16x16xf32>
    %7 = vector.shape_cast %4 : vector<16x16xf32> to vector<1x16x16xf32>
    tpu.vector_store %arg2[%c0_3, %c0_4, %c0_5], %7 {strides = array<i32>} : memref<2x16x16xf32, #tpu.memory_space<vmem>>, vector<1x16x16xf32>,
    %c1_6 = arith.constant 1 : index
    %c0_7 = arith.constant 0 : index
    %c1_8 = arith.constant 1 : index
    %8 = tpu.strided_load %arg2[%c1_6, %c0_7, %c1_8] {strides = array<i32: 1, 1, 2>} : memref<2x16x16xf32, #tpu.memory_space<vmem>>, vector<1x16x8xf32>
    %9 = vector.shape_cast %8 : vector<1x16x8xf32> to vector<16x8xf32>
    %10 = vector.extract_strided_slice %9 {offsets = [0, 0], sizes = [3, 8], strides = [1, 1]} : vector<16x8xf32> to vector<3x8xf32>
    %c0_9 = arith.constant 0 : index
    %c0_10 = arith.constant 0 : index
    %c0_11 = arith.constant 0 : index
    %11 = tpu.strided_load %arg2[%c0_9, %c0_10, %c0_11] {strides = array<i32: 1, 1, 2>} : memref<2x16x16xf32, #tpu.memory_space<vmem>>, vector<1x3x8xf32>
    %12 = vector.shape_cast %11 : vector<1x3x8xf32> to vector<3x8xf32>
    %13 = vector.shape_cast %10 : vector<3x8xf32> to vector<1x3x8xf32>
    tpu.strided_store %arg2[%c0_9, %c0_10, %c0_11], %13 {strides = array<i32: 1, 1, 2>} : memref<2x16x16xf32, #tpu.memory_space<vmem>>, vector<1x3x8xf32>
    %c1_12 = arith.constant 1 : index
    %c0_13 = arith.constant 0 : index
    %c0_14 = arith.constant 0 : index
    %14 = tpu.strided_load %arg2[%c1_12, %c0_13, %c0_14] {strides = array<i32: 1, 1, 2>} : memref<2x16x16xf32, #tpu.memory_space<vmem>>, vector<1x4x8xf32>
    %15 = vector.shape_cast %14 : vector<1x4x8xf32> to vector<4x8xf32>
    %c0_15 = arith.constant 0 : index
    %c8 = arith.constant 8 : index
    %c0_16 = arith.constant 0 : index
    %16 = vector.load %arg2[%c0_15, %c8, %c0_16] : memref<2x16x16xf32, #tpu.memory_space<vmem>>, vector<1x4x8xf32>
    %17 = vector.shape_cast %16 : vector<1x4x8xf32> to vector<4x8xf32>
    %18 = vector.shape_cast %15 : vector<4x8xf32> to vector<1x4x8xf32>
    tpu.vector_store %arg2[%c0_15, %c8, %c0_16], %18 {strides = array<i32>} : memref<2x16x16xf32, #tpu.memory_space<vmem>>, vector<1x4x8xf32>,
    %c0_17 = arith.constant 0 : index
    %c0_18 = arith.constant 0 : index
    %c0_19 = arith.constant 0 : index
    %19 = vector.load %arg2[%c0_17, %c0_18, %c0_19] : memref<2x16x16xf32, #tpu.memory_space<vmem>>, vector<1x16x16xf32>
    %20 = vector.shape_cast %19 : vector<1x16x16xf32> to vector<16x16xf32>
    %c0_20 = arith.constant 0 : index
    %c0_21 = arith.constant 0 : index
    %21 = vector.load %arg1[%c0_20, %c0_21] : memref<16x16xf32, #tpu.memory_space<vmem>>, vector<16x16xf32>
    tpu.vector_store %arg1[%c0_20, %c0_21], %20 {strides = array<i32>} : memref<16x16xf32, #tpu.memory_space<vmem>>, vector<16x16xf32>,
    return
  }
}

module attributes {stable_mosaic.version = 11 : i64} {
  func.func @_fused_forward_kernel(%arg0: i32, %arg1: memref<1x1x32xf32, #tpu.memory_space<vmem>>, %arg2: memref<25x81xf32, #tpu.memory_space<vmem>>, %arg3: memref<1x1x32xf32, #tpu.memory_space<vmem>>, %arg4: memref<2x16x20xf32, #tpu.memory_space<vmem>>, %arg5: memref<2x16x20xf32, #tpu.memory_space<vmem>>) attributes {dimension_semantics = [#tpu.dimension_semantics<parallel>], iteration_bounds = array<i64: 2>, scalar_prefetch = 0 : i64, scratch_operands = 2 : i64, tpu.core_type = #tpu.core_type<tc>, window_params = [{transform_indices = @transform_0, window_bounds = array<i64: 1, 1, 32>}, {pipeline_mode = #tpu.pipeline_mode<synchronous>, transform_indices = @transform_1, window_bounds = array<i64: 25, 81>}, {transform_indices = @transform_2, window_bounds = array<i64: 1, 1, 32>}]} {
    %c0 = arith.constant 0 : index
    %c0_0 = arith.constant 0 : index
    %c0_1 = arith.constant 0 : index
    %0 = vector.load %arg1[%c0, %c0_0, %c0_1] : memref<1x1x32xf32, #tpu.memory_space<vmem>>, vector<1x1x32xf32>
    %1 = vector.shape_cast %0 : vector<1x1x32xf32> to vector<1x32xf32>
    %2 = vector.extract_strided_slice %1 {offsets = [0, 0], sizes = [1, 16], strides = [1, 1]} : vector<1x32xf32> to vector<1x16xf32>
    %c0_2 = arith.constant 0 : index
    %c0_3 = arith.constant 0 : index
    %c2 = arith.constant 2 : index
    %3 = vector.load %arg4[%c0_2, %c0_3, %c2] : memref<2x16x20xf32, #tpu.memory_space<vmem>>, vector<1x1x16xf32>
    %4 = vector.shape_cast %3 : vector<1x1x16xf32> to vector<1x16xf32>
    %5 = vector.shape_cast %2 : vector<1x16xf32> to vector<1x1x16xf32>
    tpu.vector_store %arg4[%c0_2, %c0_3, %c2], %5 {strides = array<i32>} : memref<2x16x20xf32, #tpu.memory_space<vmem>>, vector<1x1x16xf32>,
    %6 = vector.extract_strided_slice %1 {offsets = [0, 16], sizes = [1, 16], strides = [1, 1]} : vector<1x32xf32> to vector<1x16xf32>
    %c1 = arith.constant 1 : index
    %c0_4 = arith.constant 0 : index
    %c2_5 = arith.constant 2 : index
    %7 = vector.load %arg4[%c1, %c0_4, %c2_5] : memref<2x16x20xf32, #tpu.memory_space<vmem>>, vector<1x1x16xf32>
    %8 = vector.shape_cast %7 : vector<1x1x16xf32> to vector<1x16xf32>
    %9 = vector.shape_cast %6 : vector<1x16xf32> to vector<1x1x16xf32>
    tpu.vector_store %arg4[%c1, %c0_4, %c2_5], %9 {strides = array<i32>} : memref<2x16x20xf32, #tpu.memory_space<vmem>>, vector<1x1x16xf32>,
    %cst = arith.constant 0.000000e+00 : f32
    %10 = vector.broadcast %cst : f32 to vector<1x2xf32>
    %c0_6 = arith.constant 0 : index
    %c0_7 = arith.constant 0 : index
    %c0_8 = arith.constant 0 : index
    %11 = vector.load %arg4[%c0_6, %c0_7, %c0_8] : memref<2x16x20xf32, #tpu.memory_space<vmem>>, vector<1x1x2xf32>
    %12 = vector.shape_cast %11 : vector<1x1x2xf32> to vector<1x2xf32>
    %13 = vector.shape_cast %10 : vector<1x2xf32> to vector<1x1x2xf32>
    tpu.vector_store %arg4[%c0_6, %c0_7, %c0_8], %13 {strides = array<i32>} : memref<2x16x20xf32, #tpu.memory_space<vmem>>, vector<1x1x2xf32>,
    %c0_9 = arith.constant 0 : index
    %c0_10 = arith.constant 0 : index
    %c18 = arith.constant 18 : index
    %14 = vector.load %arg4[%c0_9, %c0_10, %c18] : memref<2x16x20xf32, #tpu.memory_space<vmem>>, vector<1x1x2xf32>
    %15 = vector.shape_cast %14 : vector<1x1x2xf32> to vector<1x2xf32>
    %16 = vector.shape_cast %10 : vector<1x2xf32> to vector<1x1x2xf32>
    tpu.vector_store %arg4[%c0_9, %c0_10, %c18], %16 {strides = array<i32>} : memref<2x16x20xf32, #tpu.memory_space<vmem>>, vector<1x1x2xf32>,
    %c1_11 = arith.constant 1 : index
    %c0_12 = arith.constant 0 : index
    %c0_13 = arith.constant 0 : index
    %17 = vector.load %arg4[%c1_11, %c0_12, %c0_13] : memref<2x16x20xf32, #tpu.memory_space<vmem>>, vector<1x1x2xf32>
    %18 = vector.shape_cast %17 : vector<1x1x2xf32> to vector<1x2xf32>
    %19 = vector.shape_cast %10 : vector<1x2xf32> to vector<1x1x2xf32>
    tpu.vector_store %arg4[%c1_11, %c0_12, %c0_13], %19 {strides = array<i32>} : memref<2x16x20xf32, #tpu.memory_space<vmem>>, vector<1x1x2xf32>,
    %c1_14 = arith.constant 1 : index
    %c0_15 = arith.constant 0 : index
    %c18_16 = arith.constant 18 : index
    %20 = vector.load %arg4[%c1_14, %c0_15, %c18_16] : memref<2x16x20xf32, #tpu.memory_space<vmem>>, vector<1x1x2xf32>
    %21 = vector.shape_cast %20 : vector<1x1x2xf32> to vector<1x2xf32>
    %22 = vector.shape_cast %10 : vector<1x2xf32> to vector<1x1x2xf32>
    tpu.vector_store %arg4[%c1_14, %c0_15, %c18_16], %22 {strides = array<i32>} : memref<2x16x20xf32, #tpu.memory_space<vmem>>, vector<1x1x2xf32>,
    %c0_17 = arith.constant 0 : index
    %c0_18 = arith.constant 0 : index
    %c1_19 = arith.constant 1 : index
    %23 = vector.load %arg4[%c0_17, %c0_18, %c1_19] : memref<2x16x20xf32, #tpu.memory_space<vmem>>, vector<1x1x16xf32>
    %24 = vector.shape_cast %23 : vector<1x1x16xf32> to vector<1x16xf32>
    %c0_20 = arith.constant 0 : index
    %c0_21 = arith.constant 0 : index
    %c2_22 = arith.constant 2 : index
    %25 = vector.load %arg4[%c0_20, %c0_21, %c2_22] : memref<2x16x20xf32, #tpu.memory_space<vmem>>, vector<1x1x16xf32>
    %26 = vector.shape_cast %25 : vector<1x1x16xf32> to vector<1x16xf32>
    %c0_23 = arith.constant 0 : index
    %c0_24 = arith.constant 0 : index
    %c3 = arith.constant 3 : index
    %27 = vector.load %arg4[%c0_23, %c0_24, %c3] : memref<2x16x20xf32, #tpu.memory_space<vmem>>, vector<1x1x16xf32>
    %28 = vector.shape_cast %27 : vector<1x1x16xf32> to vector<1x16xf32>
    %29 = tpu.concatenate %24, %26, %28 in 0 : vector<1x16xf32>, vector<1x16xf32>, vector<1x16xf32> -> vector<3x16xf32>
    %c1_25 = arith.constant 1 : index
    %c0_26 = arith.constant 0 : index
    %c1_27 = arith.constant 1 : index
    %30 = vector.load %arg4[%c1_25, %c0_26, %c1_27] : memref<2x16x20xf32, #tpu.memory_space<vmem>>, vector<1x1x16xf32>
    %31 = vector.shape_cast %30 : vector<1x1x16xf32> to vector<1x16xf32>
    %c1_28 = arith.constant 1 : index
    %c0_29 = arith.constant 0 : index
    %c2_30 = arith.constant 2 : index
    %32 = vector.load %arg4[%c1_28, %c0_29, %c2_30] : memref<2x16x20xf32, #tpu.memory_space<vmem>>, vector<1x1x16xf32>
    %33 = vector.shape_cast %32 : vector<1x1x16xf32> to vector<1x16xf32>
    %c1_31 = arith.constant 1 : index
    %c0_32 = arith.constant 0 : index
    %c3_33 = arith.constant 3 : index
    %34 = vector.load %arg4[%c1_31, %c0_32, %c3_33] : memref<2x16x20xf32, #tpu.memory_space<vmem>>, vector<1x1x16xf32>
    %35 = vector.shape_cast %34 : vector<1x1x16xf32> to vector<1x16xf32>
    %36 = tpu.concatenate %31, %33, %35 in 0 : vector<1x16xf32>, vector<1x16xf32>, vector<1x16xf32> -> vector<3x16xf32>
    %37 = tpu.concatenate %29, %36 in 1 : vector<3x16xf32>, vector<3x16xf32> -> vector<3x32xf32>
    %c0_34 = arith.constant 0 : index
    %c0_35 = arith.constant 0 : index
    %c0_36 = arith.constant 0 : index
    %38 = vector.load %arg4[%c0_34, %c0_35, %c0_36] : memref<2x16x20xf32, #tpu.memory_space<vmem>>, vector<1x1x16xf32>
    %39 = vector.shape_cast %38 : vector<1x1x16xf32> to vector<1x16xf32>
    %c0_37 = arith.constant 0 : index
    %c0_38 = arith.constant 0 : index
    %c1_39 = arith.constant 1 : index
    %40 = vector.load %arg4[%c0_37, %c0_38, %c1_39] : memref<2x16x20xf32, #tpu.memory_space<vmem>>, vector<1x1x16xf32>
    %41 = vector.shape_cast %40 : vector<1x1x16xf32> to vector<1x16xf32>
    %c0_40 = arith.constant 0 : index
    %c0_41 = arith.constant 0 : index
    %c2_42 = arith.constant 2 : index
    %42 = vector.load %arg4[%c0_40, %c0_41, %c2_42] : memref<2x16x20xf32, #tpu.memory_space<vmem>>, vector<1x1x16xf32>
    %43 = vector.shape_cast %42 : vector<1x1x16xf32> to vector<1x16xf32>
    %c0_43 = arith.constant 0 : index
    %c0_44 = arith.constant 0 : index
    %c3_45 = arith.constant 3 : index
    %44 = vector.load %arg4[%c0_43, %c0_44, %c3_45] : memref<2x16x20xf32, #tpu.memory_space<vmem>>, vector<1x1x16xf32>
    %45 = vector.shape_cast %44 : vector<1x1x16xf32> to vector<1x16xf32>
    %c0_46 = arith.constant 0 : index
    %c0_47 = arith.constant 0 : index
    %c4 = arith.constant 4 : index
    %46 = vector.load %arg4[%c0_46, %c0_47, %c4] : memref<2x16x20xf32, #tpu.memory_space<vmem>>, vector<1x1x16xf32>
    %47 = vector.shape_cast %46 : vector<1x1x16xf32> to vector<1x16xf32>
    %48 = tpu.concatenate %39, %41, %43, %45, %47 in 0 : vector<1x16xf32>, vector<1x16xf32>, vector<1x16xf32>, vector<1x16xf32>, vector<1x16xf32> -> vector<5x16xf32>
    %c1_48 = arith.constant 1 : index
    %c0_49 = arith.constant 0 : index
    %c0_50 = arith.constant 0 : index
    %49 = vector.load %arg4[%c1_48, %c0_49, %c0_50] : memref<2x16x20xf32, #tpu.memory_space<vmem>>, vector<1x1x16xf32>
    %50 = vector.shape_cast %49 : vector<1x1x16xf32> to vector<1x16xf32>
    %c1_51 = arith.constant 1 : index
    %c0_52 = arith.constant 0 : index
    %c1_53 = arith.constant 1 : index
    %51 = vector.load %arg4[%c1_51, %c0_52, %c1_53] : memref<2x16x20xf32, #tpu.memory_space<vmem>>, vector<1x1x16xf32>
    %52 = vector.shape_cast %51 : vector<1x1x16xf32> to vector<1x16xf32>
    %c1_54 = arith.constant 1 : index
    %c0_55 = arith.constant 0 : index
    %c2_56 = arith.constant 2 : index
    %53 = vector.load %arg4[%c1_54, %c0_55, %c2_56] : memref<2x16x20xf32, #tpu.memory_space<vmem>>, vector<1x1x16xf32>
    %54 = vector.shape_cast %53 : vector<1x1x16xf32> to vector<1x16xf32>
    %c1_57 = arith.constant 1 : index
    %c0_58 = arith.constant 0 : index
    %c3_59 = arith.constant 3 : index
    %55 = vector.load %arg4[%c1_57, %c0_58, %c3_59] : memref<2x16x20xf32, #tpu.memory_space<vmem>>, vector<1x1x16xf32>
    %56 = vector.shape_cast %55 : vector<1x1x16xf32> to vector<1x16xf32>
    %c1_60 = arith.constant 1 : index
    %c0_61 = arith.constant 0 : index
    %c4_62 = arith.constant 4 : index
    %57 = vector.load %arg4[%c1_60, %c0_61, %c4_62] : memref<2x16x20xf32, #tpu.memory_space<vmem>>, vector<1x1x16xf32>
    %58 = vector.shape_cast %57 : vector<1x1x16xf32> to vector<1x16xf32>
    %59 = tpu.concatenate %50, %52, %54, %56, %58 in 0 : vector<1x16xf32>, vector<1x16xf32>, vector<1x16xf32>, vector<1x16xf32>, vector<1x16xf32> -> vector<5x16xf32>
    %60 = tpu.concatenate %48, %59 in 1 : vector<5x16xf32>, vector<5x16xf32> -> vector<5x32xf32>
    %c21 = arith.constant 21 : index
    %c0_63 = arith.constant 0 : index
    %61 = vector.load %arg2[%c21, %c0_63] : memref<25x81xf32, #tpu.memory_space<vmem>>, vector<1x1xf32>
    %c0_64 = arith.constant 0 : index
    %c0_65 = arith.constant 0 : index
    %62 = vector.load %arg2[%c0_64, %c0_65] : memref<25x81xf32, #tpu.memory_space<vmem>>, vector<2x3xf32>
    %c0_66 = arith.constant 0 : index
    %c80 = arith.constant 80 : index
    %63 = vector.load %arg2[%c0_66, %c80] : memref<25x81xf32, #tpu.memory_space<vmem>>, vector<2x1xf32>
    %cst_67 = arith.constant dense<0.000000e+00> : vector<2x32xf32>
    %64 = tpu.matmul %62, %37, %cst_67 {dimension_numbers = #tpu.dot_dimension_numbers<[1], [0], [0], [1], [0, 0, 1, 1], [], []>} : vector<2x3xf32>, vector<3x32xf32>, vector<2x32xf32> -> vector<2x32xf32>
    %65 = vector.broadcast %63 : vector<2x1xf32> to vector<2x32xf32>
    %66 = arith.addf %64, %65 : vector<2x32xf32>
    %c2_68 = arith.constant 2 : index
    %c0_69 = arith.constant 0 : index
    %67 = vector.load %arg2[%c2_68, %c0_69] : memref<25x81xf32, #tpu.memory_space<vmem>>, vector<2x5xf32>
    %c2_70 = arith.constant 2 : index
    %c80_71 = arith.constant 80 : index
    %68 = vector.load %arg2[%c2_70, %c80_71] : memref<25x81xf32, #tpu.memory_space<vmem>>, vector<2x1xf32>
    %cst_72 = arith.constant dense<0.000000e+00> : vector<2x32xf32>
    %69 = tpu.matmul %67, %60, %cst_72 {dimension_numbers = #tpu.dot_dimension_numbers<[1], [0], [0], [1], [0, 0, 1, 1], [], []>} : vector<2x5xf32>, vector<5x32xf32>, vector<2x32xf32> -> vector<2x32xf32>
    %70 = vector.broadcast %68 : vector<2x1xf32> to vector<2x32xf32>
    %71 = arith.addf %69, %70 : vector<2x32xf32>
    %72 = tpu.concatenate %66, %71 in 0 : vector<2x32xf32>, vector<2x32xf32> -> vector<4x32xf32>
    %cst_73 = arith.constant 0.000000e+00 : f32
    %73 = vector.broadcast %cst_73 : f32 to vector<4x32xf32>
    %74 = arith.cmpf oge, %72, %73 : vector<4x32xf32>
    %75 = vector.broadcast %61 : vector<1x1xf32> to vector<4x32xf32>
    %76 = arith.mulf %75, %72 : vector<4x32xf32>
    %77 = arith.select %74, %72, %76 : vector<4x32xi1>, vector<4x32xf32>
    %78 = tpu.iota {dimensions = array<i32: 0>} : vector<16x8xi32>
    %79 = tpu.iota {dimensions = array<i32: 1>} : vector<16x8xi32>
    %c2_i32 = arith.constant 2 : i32
    %80 = vector.broadcast %c2_i32 : i32 to vector<16x8xi32>
    %81 = arith.muli %79, %80 : vector<16x8xi32>
    %c0_i32 = arith.constant 0 : i32
    %82 = vector.broadcast %c0_i32 : i32 to vector<16x8xi32>
    %83 = arith.addi %81, %82 : vector<16x8xi32>
    %c16_i32 = arith.constant 16 : i32
    %84 = vector.broadcast %c16_i32 : i32 to vector<16x8xi32>
    %85 = arith.cmpi sge, %83, %84 : vector<16x8xi32>
    %c30_i32 = arith.constant 30 : i32
    %86 = vector.broadcast %c30_i32 : i32 to vector<16x8xi32>
    %87 = arith.subi %86, %83 : vector<16x8xi32>
    %88 = arith.select %85, %87, %83 : vector<16x8xi1>, vector<16x8xi32>
    %89 = arith.cmpi eq, %78, %88 : vector<16x8xi32>
    %90 = arith.extui %89 : vector<16x8xi1> to vector<16x8xi32>
    %91 = arith.sitofp %90 : vector<16x8xi32> to vector<16x8xf32>
    %92 = vector.extract_strided_slice %77 {offsets = [0, 0], sizes = [4, 16], strides = [1, 1]} : vector<4x32xf32> to vector<4x16xf32>
    %cst_74 = arith.constant dense<0.000000e+00> : vector<4x8xf32>
    %93 = tpu.matmul %92, %91, %cst_74 {dimension_numbers = #tpu.dot_dimension_numbers<[1], [0], [0], [1], [0, 0, 1, 1], [], []>} : vector<4x16xf32>, vector<16x8xf32>, vector<4x8xf32> -> vector<4x8xf32>
    %c0_75 = arith.constant 0 : index
    %c0_76 = arith.constant 0 : index
    %c2_77 = arith.constant 2 : index
    %94 = vector.load %arg4[%c0_75, %c0_76, %c2_77] : memref<2x16x20xf32, #tpu.memory_space<vmem>>, vector<1x4x8xf32>
    %95 = vector.shape_cast %94 : vector<1x4x8xf32> to vector<4x8xf32>
    %96 = vector.shape_cast %93 : vector<4x8xf32> to vector<1x4x8xf32>
    tpu.vector_store %arg4[%c0_75, %c0_76, %c2_77], %96 {strides = array<i32>} : memref<2x16x20xf32, #tpu.memory_space<vmem>>, vector<1x4x8xf32>,
    %97 = vector.extract_strided_slice %77 {offsets = [0, 16], sizes = [4, 16], strides = [1, 1]} : vector<4x32xf32> to vector<4x16xf32>
    %cst_78 = arith.constant dense<0.000000e+00> : vector<4x8xf32>
    %98 = tpu.matmul %97, %91, %cst_78 {dimension_numbers = #tpu.dot_dimension_numbers<[1], [0], [0], [1], [0, 0, 1, 1], [], []>} : vector<4x16xf32>, vector<16x8xf32>, vector<4x8xf32> -> vector<4x8xf32>
    %c1_79 = arith.constant 1 : index
    %c0_80 = arith.constant 0 : index
    %c2_81 = arith.constant 2 : index
    %99 = vector.load %arg4[%c1_79, %c0_80, %c2_81] : memref<2x16x20xf32, #tpu.memory_space<vmem>>, vector<1x4x8xf32>
    %100 = vector.shape_cast %99 : vector<1x4x8xf32> to vector<4x8xf32>
    %101 = vector.shape_cast %98 : vector<4x8xf32> to vector<1x4x8xf32>
    tpu.vector_store %arg4[%c1_79, %c0_80, %c2_81], %101 {strides = array<i32>} : memref<2x16x20xf32, #tpu.memory_space<vmem>>, vector<1x4x8xf32>,
    %c2_i32_82 = arith.constant 2 : i32
    %102 = vector.broadcast %c2_i32_82 : i32 to vector<16x8xi32>
    %103 = arith.muli %79, %102 : vector<16x8xi32>
    %c1_i32 = arith.constant 1 : i32
    %104 = vector.broadcast %c1_i32 : i32 to vector<16x8xi32>
    %105 = arith.addi %103, %104 : vector<16x8xi32>
    %c16_i32_83 = arith.constant 16 : i32
    %106 = vector.broadcast %c16_i32_83 : i32 to vector<16x8xi32>
    %107 = arith.cmpi sge, %105, %106 : vector<16x8xi32>
    %c30_i32_84 = arith.constant 30 : i32
    %108 = vector.broadcast %c30_i32_84 : i32 to vector<16x8xi32>
    %109 = arith.subi %108, %105 : vector<16x8xi32>
    %110 = arith.select %107, %109, %105 : vector<16x8xi1>, vector<16x8xi32>
    %111 = arith.cmpi eq, %78, %110 : vector<16x8xi32>
    %112 = arith.extui %111 : vector<16x8xi1> to vector<16x8xi32>
    %113 = arith.sitofp %112 : vector<16x8xi32> to vector<16x8xf32>
    %114 = vector.extract_strided_slice %77 {offsets = [0, 0], sizes = [4, 16], strides = [1, 1]} : vector<4x32xf32> to vector<4x16xf32>
    %cst_85 = arith.constant dense<0.000000e+00> : vector<4x8xf32>
    %115 = tpu.matmul %114, %113, %cst_85 {dimension_numbers = #tpu.dot_dimension_numbers<[1], [0], [0], [1], [0, 0, 1, 1], [], []>} : vector<4x16xf32>, vector<16x8xf32>, vector<4x8xf32> -> vector<4x8xf32>
    %c0_86 = arith.constant 0 : index
    %c4_87 = arith.constant 4 : index
    %c2_88 = arith.constant 2 : index
    %116 = vector.load %arg4[%c0_86, %c4_87, %c2_88] : memref<2x16x20xf32, #tpu.memory_space<vmem>>, vector<1x4x8xf32>
    %117 = vector.shape_cast %116 : vector<1x4x8xf32> to vector<4x8xf32>
    %118 = vector.shape_cast %115 : vector<4x8xf32> to vector<1x4x8xf32>
    tpu.vector_store %arg4[%c0_86, %c4_87, %c2_88], %118 {strides = array<i32>} : memref<2x16x20xf32, #tpu.memory_space<vmem>>, vector<1x4x8xf32>,
    %119 = vector.extract_strided_slice %77 {offsets = [0, 16], sizes = [4, 16], strides = [1, 1]} : vector<4x32xf32> to vector<4x16xf32>
    %cst_89 = arith.constant dense<0.000000e+00> : vector<4x8xf32>
    %120 = tpu.matmul %119, %113, %cst_89 {dimension_numbers = #tpu.dot_dimension_numbers<[1], [0], [0], [1], [0, 0, 1, 1], [], []>} : vector<4x16xf32>, vector<16x8xf32>, vector<4x8xf32> -> vector<4x8xf32>
    %c1_90 = arith.constant 1 : index
    %c4_91 = arith.constant 4 : index
    %c2_92 = arith.constant 2 : index
    %121 = vector.load %arg4[%c1_90, %c4_91, %c2_92] : memref<2x16x20xf32, #tpu.memory_space<vmem>>, vector<1x4x8xf32>
    %122 = vector.shape_cast %121 : vector<1x4x8xf32> to vector<4x8xf32>
    %123 = vector.shape_cast %120 : vector<4x8xf32> to vector<1x4x8xf32>
    tpu.vector_store %arg4[%c1_90, %c4_91, %c2_92], %123 {strides = array<i32>} : memref<2x16x20xf32, #tpu.memory_space<vmem>>, vector<1x4x8xf32>,
    %cst_93 = arith.constant 0.000000e+00 : f32
    %124 = vector.broadcast %cst_93 : f32 to vector<8x2xf32>
    %c0_94 = arith.constant 0 : index
    %c0_95 = arith.constant 0 : index
    %c0_96 = arith.constant 0 : index
    %125 = vector.load %arg4[%c0_94, %c0_95, %c0_96] : memref<2x16x20xf32, #tpu.memory_space<vmem>>, vector<1x8x2xf32>
    %126 = vector.shape_cast %125 : vector<1x8x2xf32> to vector<8x2xf32>
    %127 = vector.shape_cast %124 : vector<8x2xf32> to vector<1x8x2xf32>
    tpu.vector_store %arg4[%c0_94, %c0_95, %c0_96], %127 {strides = array<i32>} : memref<2x16x20xf32, #tpu.memory_space<vmem>>, vector<1x8x2xf32>,
    %c0_97 = arith.constant 0 : index
    %c0_98 = arith.constant 0 : index
    %c10 = arith.constant 10 : index
    %128 = vector.load %arg4[%c0_97, %c0_98, %c10] : memref<2x16x20xf32, #tpu.memory_space<vmem>>, vector<1x8x2xf32>
    %129 = vector.shape_cast %128 : vector<1x8x2xf32> to vector<8x2xf32>
    %130 = vector.shape_cast %124 : vector<8x2xf32> to vector<1x8x2xf32>
    tpu.vector_store %arg4[%c0_97, %c0_98, %c10], %130 {strides = array<i32>} : memref<2x16x20xf32, #tpu.memory_space<vmem>>, vector<1x8x2xf32>,
    %c1_99 = arith.constant 1 : index
    %c0_100 = arith.constant 0 : index
    %c0_101 = arith.constant 0 : index
    %131 = vector.load %arg4[%c1_99, %c0_100, %c0_101] : memref<2x16x20xf32, #tpu.memory_space<vmem>>, vector<1x8x2xf32>
    %132 = vector.shape_cast %131 : vector<1x8x2xf32> to vector<8x2xf32>
    %133 = vector.shape_cast %124 : vector<8x2xf32> to vector<1x8x2xf32>
    tpu.vector_store %arg4[%c1_99, %c0_100, %c0_101], %133 {strides = array<i32>} : memref<2x16x20xf32, #tpu.memory_space<vmem>>, vector<1x8x2xf32>,
    %c1_102 = arith.constant 1 : index
    %c0_103 = arith.constant 0 : index
    %c10_104 = arith.constant 10 : index
    %134 = vector.load %arg4[%c1_102, %c0_103, %c10_104] : memref<2x16x20xf32, #tpu.memory_space<vmem>>, vector<1x8x2xf32>
    %135 = vector.shape_cast %134 : vector<1x8x2xf32> to vector<8x2xf32>
    %136 = vector.shape_cast %124 : vector<8x2xf32> to vector<1x8x2xf32>
    tpu.vector_store %arg4[%c1_102, %c0_103, %c10_104], %136 {strides = array<i32>} : memref<2x16x20xf32, #tpu.memory_space<vmem>>, vector<1x8x2xf32>,
    %c0_105 = arith.constant 0 : index
    %c0_106 = arith.constant 0 : index
    %c1_107 = arith.constant 1 : index
    %137 = vector.load %arg4[%c0_105, %c0_106, %c1_107] : memref<2x16x20xf32, #tpu.memory_space<vmem>>, vector<1x8x8xf32>
    %138 = vector.shape_cast %137 : vector<1x8x8xf32> to vector<8x8xf32>
    %c0_108 = arith.constant 0 : index
    %c0_109 = arith.constant 0 : index
    %c2_110 = arith.constant 2 : index
    %139 = vector.load %arg4[%c0_108, %c0_109, %c2_110] : memref<2x16x20xf32, #tpu.memory_space<vmem>>, vector<1x8x8xf32>
    %140 = vector.shape_cast %139 : vector<1x8x8xf32> to vector<8x8xf32>
    %c0_111 = arith.constant 0 : index
    %c0_112 = arith.constant 0 : index
    %c3_113 = arith.constant 3 : index
    %141 = vector.load %arg4[%c0_111, %c0_112, %c3_113] : memref<2x16x20xf32, #tpu.memory_space<vmem>>, vector<1x8x8xf32>
    %142 = vector.shape_cast %141 : vector<1x8x8xf32> to vector<8x8xf32>
    %143 = tpu.concatenate %138, %140, %142 in 0 : vector<8x8xf32>, vector<8x8xf32>, vector<8x8xf32> -> vector<24x8xf32>
    %c1_114 = arith.constant 1 : index
    %c0_115 = arith.constant 0 : index
    %c1_116 = arith.constant 1 : index
    %144 = vector.load %arg4[%c1_114, %c0_115, %c1_116] : memref<2x16x20xf32, #tpu.memory_space<vmem>>, vector<1x8x8xf32>
    %145 = vector.shape_cast %144 : vector<1x8x8xf32> to vector<8x8xf32>
    %c1_117 = arith.constant 1 : index
    %c0_118 = arith.constant 0 : index
    %c2_119 = arith.constant 2 : index
    %146 = vector.load %arg4[%c1_117, %c0_118, %c2_119] : memref<2x16x20xf32, #tpu.memory_space<vmem>>, vector<1x8x8xf32>
    %147 = vector.shape_cast %146 : vector<1x8x8xf32> to vector<8x8xf32>
    %c1_120 = arith.constant 1 : index
    %c0_121 = arith.constant 0 : index
    %c3_122 = arith.constant 3 : index
    %148 = vector.load %arg4[%c1_120, %c0_121, %c3_122] : memref<2x16x20xf32, #tpu.memory_space<vmem>>, vector<1x8x8xf32>
    %149 = vector.shape_cast %148 : vector<1x8x8xf32> to vector<8x8xf32>
    %150 = tpu.concatenate %145, %147, %149 in 0 : vector<8x8xf32>, vector<8x8xf32>, vector<8x8xf32> -> vector<24x8xf32>
    %151 = tpu.concatenate %143, %150 in 1 : vector<24x8xf32>, vector<24x8xf32> -> vector<24x16xf32>
    %c0_123 = arith.constant 0 : index
    %c0_124 = arith.constant 0 : index
    %c0_125 = arith.constant 0 : index
    %152 = vector.load %arg4[%c0_123, %c0_124, %c0_125] : memref<2x16x20xf32, #tpu.memory_space<vmem>>, vector<1x8x8xf32>
    %153 = vector.shape_cast %152 : vector<1x8x8xf32> to vector<8x8xf32>
    %c0_126 = arith.constant 0 : index
    %c0_127 = arith.constant 0 : index
    %c1_128 = arith.constant 1 : index
    %154 = vector.load %arg4[%c0_126, %c0_127, %c1_128] : memref<2x16x20xf32, #tpu.memory_space<vmem>>, vector<1x8x8xf32>
    %155 = vector.shape_cast %154 : vector<1x8x8xf32> to vector<8x8xf32>
    %c0_129 = arith.constant 0 : index
    %c0_130 = arith.constant 0 : index
    %c2_131 = arith.constant 2 : index
    %156 = vector.load %arg4[%c0_129, %c0_130, %c2_131] : memref<2x16x20xf32, #tpu.memory_space<vmem>>, vector<1x8x8xf32>
    %157 = vector.shape_cast %156 : vector<1x8x8xf32> to vector<8x8xf32>
    %c0_132 = arith.constant 0 : index
    %c0_133 = arith.constant 0 : index
    %c3_134 = arith.constant 3 : index
    %158 = vector.load %arg4[%c0_132, %c0_133, %c3_134] : memref<2x16x20xf32, #tpu.memory_space<vmem>>, vector<1x8x8xf32>
    %159 = vector.shape_cast %158 : vector<1x8x8xf32> to vector<8x8xf32>
    %c0_135 = arith.constant 0 : index
    %c0_136 = arith.constant 0 : index
    %c4_137 = arith.constant 4 : index
    %160 = vector.load %arg4[%c0_135, %c0_136, %c4_137] : memref<2x16x20xf32, #tpu.memory_space<vmem>>, vector<1x8x8xf32>
    %161 = vector.shape_cast %160 : vector<1x8x8xf32> to vector<8x8xf32>
    %162 = tpu.concatenate %153, %155, %157, %159, %161 in 0 : vector<8x8xf32>, vector<8x8xf32>, vector<8x8xf32>, vector<8x8xf32>, vector<8x8xf32> -> vector<40x8xf32>
    %c1_138 = arith.constant 1 : index
    %c0_139 = arith.constant 0 : index
    %c0_140 = arith.constant 0 : index
    %163 = vector.load %arg4[%c1_138, %c0_139, %c0_140] : memref<2x16x20xf32, #tpu.memory_space<vmem>>, vector<1x8x8xf32>
    %164 = vector.shape_cast %163 : vector<1x8x8xf32> to vector<8x8xf32>
    %c1_141 = arith.constant 1 : index
    %c0_142 = arith.constant 0 : index
    %c1_143 = arith.constant 1 : index
    %165 = vector.load %arg4[%c1_141, %c0_142, %c1_143] : memref<2x16x20xf32, #tpu.memory_space<vmem>>, vector<1x8x8xf32>
    %166 = vector.shape_cast %165 : vector<1x8x8xf32> to vector<8x8xf32>
    %c1_144 = arith.constant 1 : index
    %c0_145 = arith.constant 0 : index
    %c2_146 = arith.constant 2 : index
    %167 = vector.load %arg4[%c1_144, %c0_145, %c2_146] : memref<2x16x20xf32, #tpu.memory_space<vmem>>, vector<1x8x8xf32>
    %168 = vector.shape_cast %167 : vector<1x8x8xf32> to vector<8x8xf32>
    %c1_147 = arith.constant 1 : index
    %c0_148 = arith.constant 0 : index
    %c3_149 = arith.constant 3 : index
    %169 = vector.load %arg4[%c1_147, %c0_148, %c3_149] : memref<2x16x20xf32, #tpu.memory_space<vmem>>, vector<1x8x8xf32>
    %170 = vector.shape_cast %169 : vector<1x8x8xf32> to vector<8x8xf32>
    %c1_150 = arith.constant 1 : index
    %c0_151 = arith.constant 0 : index
    %c4_152 = arith.constant 4 : index
    %171 = vector.load %arg4[%c1_150, %c0_151, %c4_152] : memref<2x16x20xf32, #tpu.memory_space<vmem>>, vector<1x8x8xf32>
    %172 = vector.shape_cast %171 : vector<1x8x8xf32> to vector<8x8xf32>
    %173 = tpu.concatenate %164, %166, %168, %170, %172 in 0 : vector<8x8xf32>, vector<8x8xf32>, vector<8x8xf32>, vector<8x8xf32>, vector<8x8xf32> -> vector<40x8xf32>
    %174 = tpu.concatenate %162, %173 in 1 : vector<40x8xf32>, vector<40x8xf32> -> vector<40x16xf32>
    %c22 = arith.constant 22 : index
    %c0_153 = arith.constant 0 : index
    %175 = vector.load %arg2[%c22, %c0_153] : memref<25x81xf32, #tpu.memory_space<vmem>>, vector<1x1xf32>
    %c4_154 = arith.constant 4 : index
    %c0_155 = arith.constant 0 : index
    %176 = vector.load %arg2[%c4_154, %c0_155] : memref<25x81xf32, #tpu.memory_space<vmem>>, vector<4x24xf32>
    %c4_156 = arith.constant 4 : index
    %c80_157 = arith.constant 80 : index
    %177 = vector.load %arg2[%c4_156, %c80_157] : memref<25x81xf32, #tpu.memory_space<vmem>>, vector<4x1xf32>
    %cst_158 = arith.constant dense<0.000000e+00> : vector<4x16xf32>
    %178 = tpu.matmul %176, %151, %cst_158 {dimension_numbers = #tpu.dot_dimension_numbers<[1], [0], [0], [1], [0, 0, 1, 1], [], []>} : vector<4x24xf32>, vector<24x16xf32>, vector<4x16xf32> -> vector<4x16xf32>
    %179 = vector.broadcast %177 : vector<4x1xf32> to vector<4x16xf32>
    %180 = arith.addf %178, %179 : vector<4x16xf32>
    %c8 = arith.constant 8 : index
    %c0_159 = arith.constant 0 : index
    %181 = vector.load %arg2[%c8, %c0_159] : memref<25x81xf32, #tpu.memory_space<vmem>>, vector<4x40xf32>
    %c8_160 = arith.constant 8 : index
    %c80_161 = arith.constant 80 : index
    %182 = vector.load %arg2[%c8_160, %c80_161] : memref<25x81xf32, #tpu.memory_space<vmem>>, vector<4x1xf32>
    %cst_162 = arith.constant dense<0.000000e+00> : vector<4x16xf32>
    %183 = tpu.matmul %181, %174, %cst_162 {dimension_numbers = #tpu.dot_dimension_numbers<[1], [0], [0], [1], [0, 0, 1, 1], [], []>} : vector<4x40xf32>, vector<40x16xf32>, vector<4x16xf32> -> vector<4x16xf32>
    %184 = vector.broadcast %182 : vector<4x1xf32> to vector<4x16xf32>
    %185 = arith.addf %183, %184 : vector<4x16xf32>
    %186 = tpu.concatenate %180, %185 in 0 : vector<4x16xf32>, vector<4x16xf32> -> vector<8x16xf32>
    %cst_163 = arith.constant 0.000000e+00 : f32
    %187 = vector.broadcast %cst_163 : f32 to vector<8x16xf32>
    %188 = arith.cmpf oge, %186, %187 : vector<8x16xf32>
    %189 = vector.broadcast %175 : vector<1x1xf32> to vector<8x16xf32>
    %190 = arith.mulf %189, %186 : vector<8x16xf32>
    %191 = arith.select %188, %186, %190 : vector<8x16xi1>, vector<8x16xf32>
    %192 = tpu.iota {dimensions = array<i32: 0>} : vector<8x4xi32>
    %193 = tpu.iota {dimensions = array<i32: 1>} : vector<8x4xi32>
    %c2_i32_164 = arith.constant 2 : i32
    %194 = vector.broadcast %c2_i32_164 : i32 to vector<8x4xi32>
    %195 = arith.muli %193, %194 : vector<8x4xi32>
    %c0_i32_165 = arith.constant 0 : i32
    %196 = vector.broadcast %c0_i32_165 : i32 to vector<8x4xi32>
    %197 = arith.addi %195, %196 : vector<8x4xi32>
    %c8_i32 = arith.constant 8 : i32
    %198 = vector.broadcast %c8_i32 : i32 to vector<8x4xi32>
    %199 = arith.cmpi sge, %197, %198 : vector<8x4xi32>
    %c14_i32 = arith.constant 14 : i32
    %200 = vector.broadcast %c14_i32 : i32 to vector<8x4xi32>
    %201 = arith.subi %200, %197 : vector<8x4xi32>
    %202 = arith.select %199, %201, %197 : vector<8x4xi1>, vector<8x4xi32>
    %203 = arith.cmpi eq, %192, %202 : vector<8x4xi32>
    %204 = arith.extui %203 : vector<8x4xi1> to vector<8x4xi32>
    %205 = arith.sitofp %204 : vector<8x4xi32> to vector<8x4xf32>
    %206 = vector.extract_strided_slice %191 {offsets = [0, 0], sizes = [8, 8], strides = [1, 1]} : vector<8x16xf32> to vector<8x8xf32>
    %cst_166 = arith.constant dense<0.000000e+00> : vector<8x4xf32>
    %207 = tpu.matmul %206, %205, %cst_166 {dimension_numbers = #tpu.dot_dimension_numbers<[1], [0], [0], [1], [0, 0, 1, 1], [], []>} : vector<8x8xf32>, vector<8x4xf32>, vector<8x4xf32> -> vector<8x4xf32>
    %c0_167 = arith.constant 0 : index
    %c0_168 = arith.constant 0 : index
    %c2_169 = arith.constant 2 : index
    %208 = vector.load %arg4[%c0_167, %c0_168, %c2_169] : memref<2x16x20xf32, #tpu.memory_space<vmem>>, vector<1x8x4xf32>
    %209 = vector.shape_cast %208 : vector<1x8x4xf32> to vector<8x4xf32>
    %210 = vector.shape_cast %207 : vector<8x4xf32> to vector<1x8x4xf32>
    tpu.vector_store %arg4[%c0_167, %c0_168, %c2_169], %210 {strides = array<i32>} : memref<2x16x20xf32, #tpu.memory_space<vmem>>, vector<1x8x4xf32>,
    %211 = vector.extract_strided_slice %191 {offsets = [0, 8], sizes = [8, 8], strides = [1, 1]} : vector<8x16xf32> to vector<8x8xf32>
    %cst_170 = arith.constant dense<0.000000e+00> : vector<8x4xf32>
    %212 = tpu.matmul %211, %205, %cst_170 {dimension_numbers = #tpu.dot_dimension_numbers<[1], [0], [0], [1], [0, 0, 1, 1], [], []>} : vector<8x8xf32>, vector<8x4xf32>, vector<8x4xf32> -> vector<8x4xf32>
    %c1_171 = arith.constant 1 : index
    %c0_172 = arith.constant 0 : index
    %c2_173 = arith.constant 2 : index
    %213 = vector.load %arg4[%c1_171, %c0_172, %c2_173] : memref<2x16x20xf32, #tpu.memory_space<vmem>>, vector<1x8x4xf32>
    %214 = vector.shape_cast %213 : vector<1x8x4xf32> to vector<8x4xf32>
    %215 = vector.shape_cast %212 : vector<8x4xf32> to vector<1x8x4xf32>
    tpu.vector_store %arg4[%c1_171, %c0_172, %c2_173], %215 {strides = array<i32>} : memref<2x16x20xf32, #tpu.memory_space<vmem>>, vector<1x8x4xf32>,
    %c2_i32_174 = arith.constant 2 : i32
    %216 = vector.broadcast %c2_i32_174 : i32 to vector<8x4xi32>
    %217 = arith.muli %193, %216 : vector<8x4xi32>
    %c1_i32_175 = arith.constant 1 : i32
    %218 = vector.broadcast %c1_i32_175 : i32 to vector<8x4xi32>
    %219 = arith.addi %217, %218 : vector<8x4xi32>
    %c8_i32_176 = arith.constant 8 : i32
    %220 = vector.broadcast %c8_i32_176 : i32 to vector<8x4xi32>
    %221 = arith.cmpi sge, %219, %220 : vector<8x4xi32>
    %c14_i32_177 = arith.constant 14 : i32
    %222 = vector.broadcast %c14_i32_177 : i32 to vector<8x4xi32>
    %223 = arith.subi %222, %219 : vector<8x4xi32>
    %224 = arith.select %221, %223, %219 : vector<8x4xi1>, vector<8x4xi32>
    %225 = arith.cmpi eq, %192, %224 : vector<8x4xi32>
    %226 = arith.extui %225 : vector<8x4xi1> to vector<8x4xi32>
    %227 = arith.sitofp %226 : vector<8x4xi32> to vector<8x4xf32>
    %228 = vector.extract_strided_slice %191 {offsets = [0, 0], sizes = [8, 8], strides = [1, 1]} : vector<8x16xf32> to vector<8x8xf32>
    %cst_178 = arith.constant dense<0.000000e+00> : vector<8x4xf32>
    %229 = tpu.matmul %228, %227, %cst_178 {dimension_numbers = #tpu.dot_dimension_numbers<[1], [0], [0], [1], [0, 0, 1, 1], [], []>} : vector<8x8xf32>, vector<8x4xf32>, vector<8x4xf32> -> vector<8x4xf32>
    %c0_179 = arith.constant 0 : index
    %c8_180 = arith.constant 8 : index
    %c2_181 = arith.constant 2 : index
    %230 = vector.load %arg4[%c0_179, %c8_180, %c2_181] : memref<2x16x20xf32, #tpu.memory_space<vmem>>, vector<1x8x4xf32>
    %231 = vector.shape_cast %230 : vector<1x8x4xf32> to vector<8x4xf32>
    %232 = vector.shape_cast %229 : vector<8x4xf32> to vector<1x8x4xf32>
    tpu.vector_store %arg4[%c0_179, %c8_180, %c2_181], %232 {strides = array<i32>} : memref<2x16x20xf32, #tpu.memory_space<vmem>>, vector<1x8x4xf32>,
    %233 = vector.extract_strided_slice %191 {offsets = [0, 8], sizes = [8, 8], strides = [1, 1]} : vector<8x16xf32> to vector<8x8xf32>
    %cst_182 = arith.constant dense<0.000000e+00> : vector<8x4xf32>
    %234 = tpu.matmul %233, %227, %cst_182 {dimension_numbers = #tpu.dot_dimension_numbers<[1], [0], [0], [1], [0, 0, 1, 1], [], []>} : vector<8x8xf32>, vector<8x4xf32>, vector<8x4xf32> -> vector<8x4xf32>
    %c1_183 = arith.constant 1 : index
    %c8_184 = arith.constant 8 : index
    %c2_185 = arith.constant 2 : index
    %235 = vector.load %arg4[%c1_183, %c8_184, %c2_185] : memref<2x16x20xf32, #tpu.memory_space<vmem>>, vector<1x8x4xf32>
    %236 = vector.shape_cast %235 : vector<1x8x4xf32> to vector<8x4xf32>
    %237 = vector.shape_cast %234 : vector<8x4xf32> to vector<1x8x4xf32>
    tpu.vector_store %arg4[%c1_183, %c8_184, %c2_185], %237 {strides = array<i32>} : memref<2x16x20xf32, #tpu.memory_space<vmem>>, vector<1x8x4xf32>,
    %cst_186 = arith.constant 0.000000e+00 : f32
    %238 = vector.broadcast %cst_186 : f32 to vector<16x2xf32>
    %c0_187 = arith.constant 0 : index
    %c0_188 = arith.constant 0 : index
    %c0_189 = arith.constant 0 : index
    %239 = vector.load %arg4[%c0_187, %c0_188, %c0_189] : memref<2x16x20xf32, #tpu.memory_space<vmem>>, vector<1x16x2xf32>
    %240 = vector.shape_cast %239 : vector<1x16x2xf32> to vector<16x2xf32>
    %241 = vector.shape_cast %238 : vector<16x2xf32> to vector<1x16x2xf32>
    tpu.vector_store %arg4[%c0_187, %c0_188, %c0_189], %241 {strides = array<i32>} : memref<2x16x20xf32, #tpu.memory_space<vmem>>, vector<1x16x2xf32>,
    %c0_190 = arith.constant 0 : index
    %c0_191 = arith.constant 0 : index
    %c6 = arith.constant 6 : index
    %242 = vector.load %arg4[%c0_190, %c0_191, %c6] : memref<2x16x20xf32, #tpu.memory_space<vmem>>, vector<1x16x2xf32>
    %243 = vector.shape_cast %242 : vector<1x16x2xf32> to vector<16x2xf32>
    %244 = vector.shape_cast %238 : vector<16x2xf32> to vector<1x16x2xf32>
    tpu.vector_store %arg4[%c0_190, %c0_191, %c6], %244 {strides = array<i32>} : memref<2x16x20xf32, #tpu.memory_space<vmem>>, vector<1x16x2xf32>,
    %c1_192 = arith.constant 1 : index
    %c0_193 = arith.constant 0 : index
    %c0_194 = arith.constant 0 : index
    %245 = vector.load %arg4[%c1_192, %c0_193, %c0_194] : memref<2x16x20xf32, #tpu.memory_space<vmem>>, vector<1x16x2xf32>
    %246 = vector.shape_cast %245 : vector<1x16x2xf32> to vector<16x2xf32>
    %247 = vector.shape_cast %238 : vector<16x2xf32> to vector<1x16x2xf32>
    tpu.vector_store %arg4[%c1_192, %c0_193, %c0_194], %247 {strides = array<i32>} : memref<2x16x20xf32, #tpu.memory_space<vmem>>, vector<1x16x2xf32>,
    %c1_195 = arith.constant 1 : index
    %c0_196 = arith.constant 0 : index
    %c6_197 = arith.constant 6 : index
    %248 = vector.load %arg4[%c1_195, %c0_196, %c6_197] : memref<2x16x20xf32, #tpu.memory_space<vmem>>, vector<1x16x2xf32>
    %249 = vector.shape_cast %248 : vector<1x16x2xf32> to vector<16x2xf32>
    %250 = vector.shape_cast %238 : vector<16x2xf32> to vector<1x16x2xf32>
    tpu.vector_store %arg4[%c1_195, %c0_196, %c6_197], %250 {strides = array<i32>} : memref<2x16x20xf32, #tpu.memory_space<vmem>>, vector<1x16x2xf32>,
    %c0_198 = arith.constant 0 : index
    %c0_199 = arith.constant 0 : index
    %c1_200 = arith.constant 1 : index
    %251 = vector.load %arg4[%c0_198, %c0_199, %c1_200] : memref<2x16x20xf32, #tpu.memory_space<vmem>>, vector<1x16x4xf32>
    %252 = vector.shape_cast %251 : vector<1x16x4xf32> to vector<16x4xf32>
    %c0_201 = arith.constant 0 : index
    %c0_202 = arith.constant 0 : index
    %c2_203 = arith.constant 2 : index
    %253 = vector.load %arg4[%c0_201, %c0_202, %c2_203] : memref<2x16x20xf32, #tpu.memory_space<vmem>>, vector<1x16x4xf32>
    %254 = vector.shape_cast %253 : vector<1x16x4xf32> to vector<16x4xf32>
    %c0_204 = arith.constant 0 : index
    %c0_205 = arith.constant 0 : index
    %c3_206 = arith.constant 3 : index
    %255 = vector.load %arg4[%c0_204, %c0_205, %c3_206] : memref<2x16x20xf32, #tpu.memory_space<vmem>>, vector<1x16x4xf32>
    %256 = vector.shape_cast %255 : vector<1x16x4xf32> to vector<16x4xf32>
    %257 = tpu.concatenate %252, %254, %256 in 0 : vector<16x4xf32>, vector<16x4xf32>, vector<16x4xf32> -> vector<48x4xf32>
    %c1_207 = arith.constant 1 : index
    %c0_208 = arith.constant 0 : index
    %c1_209 = arith.constant 1 : index
    %258 = vector.load %arg4[%c1_207, %c0_208, %c1_209] : memref<2x16x20xf32, #tpu.memory_space<vmem>>, vector<1x16x4xf32>
    %259 = vector.shape_cast %258 : vector<1x16x4xf32> to vector<16x4xf32>
    %c1_210 = arith.constant 1 : index
    %c0_211 = arith.constant 0 : index
    %c2_212 = arith.constant 2 : index
    %260 = vector.load %arg4[%c1_210, %c0_211, %c2_212] : memref<2x16x20xf32, #tpu.memory_space<vmem>>, vector<1x16x4xf32>
    %261 = vector.shape_cast %260 : vector<1x16x4xf32> to vector<16x4xf32>
    %c1_213 = arith.constant 1 : index
    %c0_214 = arith.constant 0 : index
    %c3_215 = arith.constant 3 : index
    %262 = vector.load %arg4[%c1_213, %c0_214, %c3_215] : memref<2x16x20xf32, #tpu.memory_space<vmem>>, vector<1x16x4xf32>
    %263 = vector.shape_cast %262 : vector<1x16x4xf32> to vector<16x4xf32>
    %264 = tpu.concatenate %259, %261, %263 in 0 : vector<16x4xf32>, vector<16x4xf32>, vector<16x4xf32> -> vector<48x4xf32>
    %265 = tpu.concatenate %257, %264 in 1 : vector<48x4xf32>, vector<48x4xf32> -> vector<48x8xf32>
    %c0_216 = arith.constant 0 : index
    %c0_217 = arith.constant 0 : index
    %c0_218 = arith.constant 0 : index
    %266 = vector.load %arg4[%c0_216, %c0_217, %c0_218] : memref<2x16x20xf32, #tpu.memory_space<vmem>>, vector<1x16x4xf32>
    %267 = vector.shape_cast %266 : vector<1x16x4xf32> to vector<16x4xf32>
    %c0_219 = arith.constant 0 : index
    %c0_220 = arith.constant 0 : index
    %c1_221 = arith.constant 1 : index
    %268 = vector.load %arg4[%c0_219, %c0_220, %c1_221] : memref<2x16x20xf32, #tpu.memory_space<vmem>>, vector<1x16x4xf32>
    %269 = vector.shape_cast %268 : vector<1x16x4xf32> to vector<16x4xf32>
    %c0_222 = arith.constant 0 : index
    %c0_223 = arith.constant 0 : index
    %c2_224 = arith.constant 2 : index
    %270 = vector.load %arg4[%c0_222, %c0_223, %c2_224] : memref<2x16x20xf32, #tpu.memory_space<vmem>>, vector<1x16x4xf32>
    %271 = vector.shape_cast %270 : vector<1x16x4xf32> to vector<16x4xf32>
    %c0_225 = arith.constant 0 : index
    %c0_226 = arith.constant 0 : index
    %c3_227 = arith.constant 3 : index
    %272 = vector.load %arg4[%c0_225, %c0_226, %c3_227] : memref<2x16x20xf32, #tpu.memory_space<vmem>>, vector<1x16x4xf32>
    %273 = vector.shape_cast %272 : vector<1x16x4xf32> to vector<16x4xf32>
    %c0_228 = arith.constant 0 : index
    %c0_229 = arith.constant 0 : index
    %c4_230 = arith.constant 4 : index
    %274 = vector.load %arg4[%c0_228, %c0_229, %c4_230] : memref<2x16x20xf32, #tpu.memory_space<vmem>>, vector<1x16x4xf32>
    %275 = vector.shape_cast %274 : vector<1x16x4xf32> to vector<16x4xf32>
    %276 = tpu.concatenate %267, %269, %271, %273, %275 in 0 : vector<16x4xf32>, vector<16x4xf32>, vector<16x4xf32>, vector<16x4xf32>, vector<16x4xf32> -> vector<80x4xf32>
    %c1_231 = arith.constant 1 : index
    %c0_232 = arith.constant 0 : index
    %c0_233 = arith.constant 0 : index
    %277 = vector.load %arg4[%c1_231, %c0_232, %c0_233] : memref<2x16x20xf32, #tpu.memory_space<vmem>>, vector<1x16x4xf32>
    %278 = vector.shape_cast %277 : vector<1x16x4xf32> to vector<16x4xf32>
    %c1_234 = arith.constant 1 : index
    %c0_235 = arith.constant 0 : index
    %c1_236 = arith.constant 1 : index
    %279 = vector.load %arg4[%c1_234, %c0_235, %c1_236] : memref<2x16x20xf32, #tpu.memory_space<vmem>>, vector<1x16x4xf32>
    %280 = vector.shape_cast %279 : vector<1x16x4xf32> to vector<16x4xf32>
    %c1_237 = arith.constant 1 : index
    %c0_238 = arith.constant 0 : index
    %c2_239 = arith.constant 2 : index
    %281 = vector.load %arg4[%c1_237, %c0_238, %c2_239] : memref<2x16x20xf32, #tpu.memory_space<vmem>>, vector<1x16x4xf32>
    %282 = vector.shape_cast %281 : vector<1x16x4xf32> to vector<16x4xf32>
    %c1_240 = arith.constant 1 : index
    %c0_241 = arith.constant 0 : index
    %c3_242 = arith.constant 3 : index
    %283 = vector.load %arg4[%c1_240, %c0_241, %c3_242] : memref<2x16x20xf32, #tpu.memory_space<vmem>>, vector<1x16x4xf32>
    %284 = vector.shape_cast %283 : vector<1x16x4xf32> to vector<16x4xf32>
    %c1_243 = arith.constant 1 : index
    %c0_244 = arith.constant 0 : index
    %c4_245 = arith.constant 4 : index
    %285 = vector.load %arg4[%c1_243, %c0_244, %c4_245] : memref<2x16x20xf32, #tpu.memory_space<vmem>>, vector<1x16x4xf32>
    %286 = vector.shape_cast %285 : vector<1x16x4xf32> to vector<16x4xf32>
    %287 = tpu.concatenate %278, %280, %282, %284, %286 in 0 : vector<16x4xf32>, vector<16x4xf32>, vector<16x4xf32>, vector<16x4xf32>, vector<16x4xf32> -> vector<80x4xf32>
    %288 = tpu.concatenate %276, %287 in 1 : vector<80x4xf32>, vector<80x4xf32> -> vector<80x8xf32>
    %c23 = arith.constant 23 : index
    %c0_246 = arith.constant 0 : index
    %289 = vector.load %arg2[%c23, %c0_246] : memref<25x81xf32, #tpu.memory_space<vmem>>, vector<1x1xf32>
    %c12 = arith.constant 12 : index
    %c0_247 = arith.constant 0 : index
    %290 = vector.load %arg2[%c12, %c0_247] : memref<25x81xf32, #tpu.memory_space<vmem>>, vector<1x48xf32>
    %c12_248 = arith.constant 12 : index
    %c80_249 = arith.constant 80 : index
    %291 = vector.load %arg2[%c12_248, %c80_249] : memref<25x81xf32, #tpu.memory_space<vmem>>, vector<1x1xf32>
    %cst_250 = arith.constant dense<0.000000e+00> : vector<1x8xf32>
    %292 = tpu.matmul %290, %265, %cst_250 {dimension_numbers = #tpu.dot_dimension_numbers<[1], [0], [0], [1], [0, 0, 1, 1], [], []>} : vector<1x48xf32>, vector<48x8xf32>, vector<1x8xf32> -> vector<1x8xf32>
    %293 = vector.broadcast %291 : vector<1x1xf32> to vector<1x8xf32>
    %294 = arith.addf %292, %293 : vector<1x8xf32>
    %c13 = arith.constant 13 : index
    %c0_251 = arith.constant 0 : index
    %295 = vector.load %arg2[%c13, %c0_251] : memref<25x81xf32, #tpu.memory_space<vmem>>, vector<1x80xf32>
    %c13_252 = arith.constant 13 : index
    %c80_253 = arith.constant 80 : index
    %296 = vector.load %arg2[%c13_252, %c80_253] : memref<25x81xf32, #tpu.memory_space<vmem>>, vector<1x1xf32>
    %cst_254 = arith.constant dense<0.000000e+00> : vector<1x8xf32>
    %297 = tpu.matmul %295, %288, %cst_254 {dimension_numbers = #tpu.dot_dimension_numbers<[1], [0], [0], [1], [0, 0, 1, 1], [], []>} : vector<1x80xf32>, vector<80x8xf32>, vector<1x8xf32> -> vector<1x8xf32>
    %298 = vector.broadcast %296 : vector<1x1xf32> to vector<1x8xf32>
    %299 = arith.addf %297, %298 : vector<1x8xf32>
    %300 = tpu.concatenate %294, %299 in 0 : vector<1x8xf32>, vector<1x8xf32> -> vector<2x8xf32>
    %cst_255 = arith.constant 0.000000e+00 : f32
    %301 = vector.broadcast %cst_255 : f32 to vector<2x8xf32>
    %302 = arith.cmpf oge, %300, %301 : vector<2x8xf32>
    %303 = vector.broadcast %289 : vector<1x1xf32> to vector<2x8xf32>
    %304 = arith.mulf %303, %300 : vector<2x8xf32>
    %305 = arith.select %302, %300, %304 : vector<2x8xi1>, vector<2x8xf32>
    %c14 = arith.constant 14 : index
    %c0_256 = arith.constant 0 : index
    %306 = vector.load %arg2[%c14, %c0_256] : memref<25x81xf32, #tpu.memory_space<vmem>>, vector<1x48xf32>
    %c14_257 = arith.constant 14 : index
    %c80_258 = arith.constant 80 : index
    %307 = vector.load %arg2[%c14_257, %c80_258] : memref<25x81xf32, #tpu.memory_space<vmem>>, vector<1x1xf32>
    %cst_259 = arith.constant dense<0.000000e+00> : vector<1x8xf32>
    %308 = tpu.matmul %306, %265, %cst_259 {dimension_numbers = #tpu.dot_dimension_numbers<[1], [0], [0], [1], [0, 0, 1, 1], [], []>} : vector<1x48xf32>, vector<48x8xf32>, vector<1x8xf32> -> vector<1x8xf32>
    %309 = vector.broadcast %307 : vector<1x1xf32> to vector<1x8xf32>
    %310 = arith.addf %308, %309 : vector<1x8xf32>
    %c15 = arith.constant 15 : index
    %c0_260 = arith.constant 0 : index
    %311 = vector.load %arg2[%c15, %c0_260] : memref<25x81xf32, #tpu.memory_space<vmem>>, vector<1x80xf32>
    %c15_261 = arith.constant 15 : index
    %c80_262 = arith.constant 80 : index
    %312 = vector.load %arg2[%c15_261, %c80_262] : memref<25x81xf32, #tpu.memory_space<vmem>>, vector<1x1xf32>
    %cst_263 = arith.constant dense<0.000000e+00> : vector<1x8xf32>
    %313 = tpu.matmul %311, %288, %cst_263 {dimension_numbers = #tpu.dot_dimension_numbers<[1], [0], [0], [1], [0, 0, 1, 1], [], []>} : vector<1x80xf32>, vector<80x8xf32>, vector<1x8xf32> -> vector<1x8xf32>
    %314 = vector.broadcast %312 : vector<1x1xf32> to vector<1x8xf32>
    %315 = arith.addf %313, %314 : vector<1x8xf32>
    %316 = tpu.concatenate %310, %315 in 0 : vector<1x8xf32>, vector<1x8xf32> -> vector<2x8xf32>
    %cst_264 = arith.constant 0.000000e+00 : f32
    %317 = vector.broadcast %cst_264 : f32 to vector<2x8xf32>
    %318 = arith.cmpf oge, %316, %317 : vector<2x8xf32>
    %319 = vector.broadcast %289 : vector<1x1xf32> to vector<2x8xf32>
    %320 = arith.mulf %319, %316 : vector<2x8xf32>
    %321 = arith.select %318, %316, %320 : vector<2x8xi1>, vector<2x8xf32>
    %322 = tpu.iota {dimensions = array<i32: 0>} : vector<4x8xi32>
    %323 = tpu.iota {dimensions = array<i32: 1>} : vector<4x8xi32>
    %c2_i32_265 = arith.constant 2 : i32
    %324 = vector.broadcast %c2_i32_265 : i32 to vector<4x8xi32>
    %325 = arith.muli %322, %324 : vector<4x8xi32>
    %c0_i32_266 = arith.constant 0 : i32
    %326 = vector.broadcast %c0_i32_266 : i32 to vector<4x8xi32>
    %327 = arith.addi %325, %326 : vector<4x8xi32>
    %328 = arith.cmpi eq, %323, %327 : vector<4x8xi32>
    %329 = arith.extui %328 : vector<4x8xi1> to vector<4x8xi32>
    %330 = arith.sitofp %329 : vector<4x8xi32> to vector<4x8xf32>
    %c2_i32_267 = arith.constant 2 : i32
    %331 = vector.broadcast %c2_i32_267 : i32 to vector<4x8xi32>
    %332 = arith.muli %322, %331 : vector<4x8xi32>
    %c1_i32_268 = arith.constant 1 : i32
    %333 = vector.broadcast %c1_i32_268 : i32 to vector<4x8xi32>
    %334 = arith.addi %332, %333 : vector<4x8xi32>
    %335 = arith.cmpi eq, %323, %334 : vector<4x8xi32>
    %336 = arith.extui %335 : vector<4x8xi1> to vector<4x8xi32>
    %337 = arith.sitofp %336 : vector<4x8xi32> to vector<4x8xf32>
    %338 = vector.extract_strided_slice %305 {offsets = [0, 0], sizes = [2, 4], strides = [1, 1]} : vector<2x8xf32> to vector<2x4xf32>
    %cst_269 = arith.constant dense<0.000000e+00> : vector<2x8xf32>
    %339 = tpu.matmul %338, %330, %cst_269 {dimension_numbers = #tpu.dot_dimension_numbers<[1], [0], [0], [1], [0, 0, 1, 1], [], []>} : vector<2x4xf32>, vector<4x8xf32>, vector<2x8xf32> -> vector<2x8xf32>
    %340 = vector.extract_strided_slice %321 {offsets = [0, 0], sizes = [2, 4], strides = [1, 1]} : vector<2x8xf32> to vector<2x4xf32>
    %cst_270 = arith.constant dense<0.000000e+00> : vector<2x8xf32>
    %341 = tpu.matmul %340, %337, %cst_270 {dimension_numbers = #tpu.dot_dimension_numbers<[1], [0], [0], [1], [0, 0, 1, 1], [], []>} : vector<2x4xf32>, vector<4x8xf32>, vector<2x8xf32> -> vector<2x8xf32>
    %342 = arith.addf %339, %341 : vector<2x8xf32>
    %c0_271 = arith.constant 0 : index
    %c0_272 = arith.constant 0 : index
    %c2_273 = arith.constant 2 : index
    %343 = vector.load %arg4[%c0_271, %c0_272, %c2_273] : memref<2x16x20xf32, #tpu.memory_space<vmem>>, vector<1x2x8xf32>
    %344 = vector.shape_cast %343 : vector<1x2x8xf32> to vector<2x8xf32>
    %345 = vector.shape_cast %342 : vector<2x8xf32> to vector<1x2x8xf32>
    tpu.vector_store %arg4[%c0_271, %c0_272, %c2_273], %345 {strides = array<i32>} : memref<2x16x20xf32, #tpu.memory_space<vmem>>, vector<1x2x8xf32>,
    %346 = vector.extract_strided_slice %305 {offsets = [0, 4], sizes = [2, 4], strides = [1, 1]} : vector<2x8xf32> to vector<2x4xf32>
    %cst_274 = arith.constant dense<0.000000e+00> : vector<2x8xf32>
    %347 = tpu.matmul %346, %330, %cst_274 {dimension_numbers = #tpu.dot_dimension_numbers<[1], [0], [0], [1], [0, 0, 1, 1], [], []>} : vector<2x4xf32>, vector<4x8xf32>, vector<2x8xf32> -> vector<2x8xf32>
    %348 = vector.extract_strided_slice %321 {offsets = [0, 4], sizes = [2, 4], strides = [1, 1]} : vector<2x8xf32> to vector<2x4xf32>
    %cst_275 = arith.constant dense<0.000000e+00> : vector<2x8xf32>
    %349 = tpu.matmul %348, %337, %cst_275 {dimension_numbers = #tpu.dot_dimension_numbers<[1], [0], [0], [1], [0, 0, 1, 1], [], []>} : vector<2x4xf32>, vector<4x8xf32>, vector<2x8xf32> -> vector<2x8xf32>
    %350 = arith.addf %347, %349 : vector<2x8xf32>
    %c1_276 = arith.constant 1 : index
    %c0_277 = arith.constant 0 : index
    %c2_278 = arith.constant 2 : index
    %351 = vector.load %arg4[%c1_276, %c0_277, %c2_278] : memref<2x16x20xf32, #tpu.memory_space<vmem>>, vector<1x2x8xf32>
    %352 = vector.shape_cast %351 : vector<1x2x8xf32> to vector<2x8xf32>
    %353 = vector.shape_cast %350 : vector<2x8xf32> to vector<1x2x8xf32>
    tpu.vector_store %arg4[%c1_276, %c0_277, %c2_278], %353 {strides = array<i32>} : memref<2x16x20xf32, #tpu.memory_space<vmem>>, vector<1x2x8xf32>,
    %cst_279 = arith.constant 0.000000e+00 : f32
    %354 = vector.broadcast %cst_279 : f32 to vector<2x2xf32>
    %c0_280 = arith.constant 0 : index
    %c0_281 = arith.constant 0 : index
    %c0_282 = arith.constant 0 : index
    %355 = vector.load %arg4[%c0_280, %c0_281, %c0_282] : memref<2x16x20xf32, #tpu.memory_space<vmem>>, vector<1x2x2xf32>
    %356 = vector.shape_cast %355 : vector<1x2x2xf32> to vector<2x2xf32>
    %357 = vector.shape_cast %354 : vector<2x2xf32> to vector<1x2x2xf32>
    tpu.vector_store %arg4[%c0_280, %c0_281, %c0_282], %357 {strides = array<i32>} : memref<2x16x20xf32, #tpu.memory_space<vmem>>, vector<1x2x2xf32>,
    %c0_283 = arith.constant 0 : index
    %c0_284 = arith.constant 0 : index
    %c10_285 = arith.constant 10 : index
    %358 = vector.load %arg4[%c0_283, %c0_284, %c10_285] : memref<2x16x20xf32, #tpu.memory_space<vmem>>, vector<1x2x2xf32>
    %359 = vector.shape_cast %358 : vector<1x2x2xf32> to vector<2x2xf32>
    %360 = vector.shape_cast %354 : vector<2x2xf32> to vector<1x2x2xf32>
    tpu.vector_store %arg4[%c0_283, %c0_284, %c10_285], %360 {strides = array<i32>} : memref<2x16x20xf32, #tpu.memory_space<vmem>>, vector<1x2x2xf32>,
    %c1_286 = arith.constant 1 : index
    %c0_287 = arith.constant 0 : index
    %c0_288 = arith.constant 0 : index
    %361 = vector.load %arg4[%c1_286, %c0_287, %c0_288] : memref<2x16x20xf32, #tpu.memory_space<vmem>>, vector<1x2x2xf32>
    %362 = vector.shape_cast %361 : vector<1x2x2xf32> to vector<2x2xf32>
    %363 = vector.shape_cast %354 : vector<2x2xf32> to vector<1x2x2xf32>
    tpu.vector_store %arg4[%c1_286, %c0_287, %c0_288], %363 {strides = array<i32>} : memref<2x16x20xf32, #tpu.memory_space<vmem>>, vector<1x2x2xf32>,
    %c1_289 = arith.constant 1 : index
    %c0_290 = arith.constant 0 : index
    %c10_291 = arith.constant 10 : index
    %364 = vector.load %arg4[%c1_289, %c0_290, %c10_291] : memref<2x16x20xf32, #tpu.memory_space<vmem>>, vector<1x2x2xf32>
    %365 = vector.shape_cast %364 : vector<1x2x2xf32> to vector<2x2xf32>
    %366 = vector.shape_cast %354 : vector<2x2xf32> to vector<1x2x2xf32>
    tpu.vector_store %arg4[%c1_289, %c0_290, %c10_291], %366 {strides = array<i32>} : memref<2x16x20xf32, #tpu.memory_space<vmem>>, vector<1x2x2xf32>,
    %c0_292 = arith.constant 0 : index
    %c0_293 = arith.constant 0 : index
    %c1_294 = arith.constant 1 : index
    %367 = vector.load %arg4[%c0_292, %c0_293, %c1_294] : memref<2x16x20xf32, #tpu.memory_space<vmem>>, vector<1x2x8xf32>
    %368 = vector.shape_cast %367 : vector<1x2x8xf32> to vector<2x8xf32>
    %c0_295 = arith.constant 0 : index
    %c0_296 = arith.constant 0 : index
    %c2_297 = arith.constant 2 : index
    %369 = vector.load %arg4[%c0_295, %c0_296, %c2_297] : memref<2x16x20xf32, #tpu.memory_space<vmem>>, vector<1x2x8xf32>
    %370 = vector.shape_cast %369 : vector<1x2x8xf32> to vector<2x8xf32>
    %c0_298 = arith.constant 0 : index
    %c0_299 = arith.constant 0 : index
    %c3_300 = arith.constant 3 : index
    %371 = vector.load %arg4[%c0_298, %c0_299, %c3_300] : memref<2x16x20xf32, #tpu.memory_space<vmem>>, vector<1x2x8xf32>
    %372 = vector.shape_cast %371 : vector<1x2x8xf32> to vector<2x8xf32>
    %373 = tpu.concatenate %368, %370, %372 in 0 : vector<2x8xf32>, vector<2x8xf32>, vector<2x8xf32> -> vector<6x8xf32>
    %c1_301 = arith.constant 1 : index
    %c0_302 = arith.constant 0 : index
    %c1_303 = arith.constant 1 : index
    %374 = vector.load %arg4[%c1_301, %c0_302, %c1_303] : memref<2x16x20xf32, #tpu.memory_space<vmem>>, vector<1x2x8xf32>
    %375 = vector.shape_cast %374 : vector<1x2x8xf32> to vector<2x8xf32>
    %c1_304 = arith.constant 1 : index
    %c0_305 = arith.constant 0 : index
    %c2_306 = arith.constant 2 : index
    %376 = vector.load %arg4[%c1_304, %c0_305, %c2_306] : memref<2x16x20xf32, #tpu.memory_space<vmem>>, vector<1x2x8xf32>
    %377 = vector.shape_cast %376 : vector<1x2x8xf32> to vector<2x8xf32>
    %c1_307 = arith.constant 1 : index
    %c0_308 = arith.constant 0 : index
    %c3_309 = arith.constant 3 : index
    %378 = vector.load %arg4[%c1_307, %c0_308, %c3_309] : memref<2x16x20xf32, #tpu.memory_space<vmem>>, vector<1x2x8xf32>
    %379 = vector.shape_cast %378 : vector<1x2x8xf32> to vector<2x8xf32>
    %380 = tpu.concatenate %375, %377, %379 in 0 : vector<2x8xf32>, vector<2x8xf32>, vector<2x8xf32> -> vector<6x8xf32>
    %381 = tpu.concatenate %373, %380 in 1 : vector<6x8xf32>, vector<6x8xf32> -> vector<6x16xf32>
    %c0_310 = arith.constant 0 : index
    %c0_311 = arith.constant 0 : index
    %c0_312 = arith.constant 0 : index
    %382 = vector.load %arg4[%c0_310, %c0_311, %c0_312] : memref<2x16x20xf32, #tpu.memory_space<vmem>>, vector<1x2x8xf32>
    %383 = vector.shape_cast %382 : vector<1x2x8xf32> to vector<2x8xf32>
    %c0_313 = arith.constant 0 : index
    %c0_314 = arith.constant 0 : index
    %c1_315 = arith.constant 1 : index
    %384 = vector.load %arg4[%c0_313, %c0_314, %c1_315] : memref<2x16x20xf32, #tpu.memory_space<vmem>>, vector<1x2x8xf32>
    %385 = vector.shape_cast %384 : vector<1x2x8xf32> to vector<2x8xf32>
    %c0_316 = arith.constant 0 : index
    %c0_317 = arith.constant 0 : index
    %c2_318 = arith.constant 2 : index
    %386 = vector.load %arg4[%c0_316, %c0_317, %c2_318] : memref<2x16x20xf32, #tpu.memory_space<vmem>>, vector<1x2x8xf32>
    %387 = vector.shape_cast %386 : vector<1x2x8xf32> to vector<2x8xf32>
    %c0_319 = arith.constant 0 : index
    %c0_320 = arith.constant 0 : index
    %c3_321 = arith.constant 3 : index
    %388 = vector.load %arg4[%c0_319, %c0_320, %c3_321] : memref<2x16x20xf32, #tpu.memory_space<vmem>>, vector<1x2x8xf32>
    %389 = vector.shape_cast %388 : vector<1x2x8xf32> to vector<2x8xf32>
    %c0_322 = arith.constant 0 : index
    %c0_323 = arith.constant 0 : index
    %c4_324 = arith.constant 4 : index
    %390 = vector.load %arg4[%c0_322, %c0_323, %c4_324] : memref<2x16x20xf32, #tpu.memory_space<vmem>>, vector<1x2x8xf32>
    %391 = vector.shape_cast %390 : vector<1x2x8xf32> to vector<2x8xf32>
    %392 = tpu.concatenate %383, %385, %387, %389, %391 in 0 : vector<2x8xf32>, vector<2x8xf32>, vector<2x8xf32>, vector<2x8xf32>, vector<2x8xf32> -> vector<10x8xf32>
    %c1_325 = arith.constant 1 : index
    %c0_326 = arith.constant 0 : index
    %c0_327 = arith.constant 0 : index
    %393 = vector.load %arg4[%c1_325, %c0_326, %c0_327] : memref<2x16x20xf32, #tpu.memory_space<vmem>>, vector<1x2x8xf32>
    %394 = vector.shape_cast %393 : vector<1x2x8xf32> to vector<2x8xf32>
    %c1_328 = arith.constant 1 : index
    %c0_329 = arith.constant 0 : index
    %c1_330 = arith.constant 1 : index
    %395 = vector.load %arg4[%c1_328, %c0_329, %c1_330] : memref<2x16x20xf32, #tpu.memory_space<vmem>>, vector<1x2x8xf32>
    %396 = vector.shape_cast %395 : vector<1x2x8xf32> to vector<2x8xf32>
    %c1_331 = arith.constant 1 : index
    %c0_332 = arith.constant 0 : index
    %c2_333 = arith.constant 2 : index
    %397 = vector.load %arg4[%c1_331, %c0_332, %c2_333] : memref<2x16x20xf32, #tpu.memory_space<vmem>>, vector<1x2x8xf32>
    %398 = vector.shape_cast %397 : vector<1x2x8xf32> to vector<2x8xf32>
    %c1_334 = arith.constant 1 : index
    %c0_335 = arith.constant 0 : index
    %c3_336 = arith.constant 3 : index
    %399 = vector.load %arg4[%c1_334, %c0_335, %c3_336] : memref<2x16x20xf32, #tpu.memory_space<vmem>>, vector<1x2x8xf32>
    %400 = vector.shape_cast %399 : vector<1x2x8xf32> to vector<2x8xf32>
    %c1_337 = arith.constant 1 : index
    %c0_338 = arith.constant 0 : index
    %c4_339 = arith.constant 4 : index
    %401 = vector.load %arg4[%c1_337, %c0_338, %c4_339] : memref<2x16x20xf32, #tpu.memory_space<vmem>>, vector<1x2x8xf32>
    %402 = vector.shape_cast %401 : vector<1x2x8xf32> to vector<2x8xf32>
    %403 = tpu.concatenate %394, %396, %398, %400, %402 in 0 : vector<2x8xf32>, vector<2x8xf32>, vector<2x8xf32>, vector<2x8xf32>, vector<2x8xf32> -> vector<10x8xf32>
    %404 = tpu.concatenate %392, %403 in 1 : vector<10x8xf32>, vector<10x8xf32> -> vector<10x16xf32>
    %c24 = arith.constant 24 : index
    %c0_340 = arith.constant 0 : index
    %405 = vector.load %arg2[%c24, %c0_340] : memref<25x81xf32, #tpu.memory_space<vmem>>, vector<1x1xf32>
    %c16 = arith.constant 16 : index
    %c0_341 = arith.constant 0 : index
    %406 = vector.load %arg2[%c16, %c0_341] : memref<25x81xf32, #tpu.memory_space<vmem>>, vector<1x6xf32>
    %c16_342 = arith.constant 16 : index
    %c80_343 = arith.constant 80 : index
    %407 = vector.load %arg2[%c16_342, %c80_343] : memref<25x81xf32, #tpu.memory_space<vmem>>, vector<1x1xf32>
    %cst_344 = arith.constant dense<0.000000e+00> : vector<1x16xf32>
    %408 = tpu.matmul %406, %381, %cst_344 {dimension_numbers = #tpu.dot_dimension_numbers<[1], [0], [0], [1], [0, 0, 1, 1], [], []>} : vector<1x6xf32>, vector<6x16xf32>, vector<1x16xf32> -> vector<1x16xf32>
    %409 = vector.broadcast %407 : vector<1x1xf32> to vector<1x16xf32>
    %410 = arith.addf %408, %409 : vector<1x16xf32>
    %c17 = arith.constant 17 : index
    %c0_345 = arith.constant 0 : index
    %411 = vector.load %arg2[%c17, %c0_345] : memref<25x81xf32, #tpu.memory_space<vmem>>, vector<1x10xf32>
    %c17_346 = arith.constant 17 : index
    %c80_347 = arith.constant 80 : index
    %412 = vector.load %arg2[%c17_346, %c80_347] : memref<25x81xf32, #tpu.memory_space<vmem>>, vector<1x1xf32>
    %cst_348 = arith.constant dense<0.000000e+00> : vector<1x16xf32>
    %413 = tpu.matmul %411, %404, %cst_348 {dimension_numbers = #tpu.dot_dimension_numbers<[1], [0], [0], [1], [0, 0, 1, 1], [], []>} : vector<1x10xf32>, vector<10x16xf32>, vector<1x16xf32> -> vector<1x16xf32>
    %414 = vector.broadcast %412 : vector<1x1xf32> to vector<1x16xf32>
    %415 = arith.addf %413, %414 : vector<1x16xf32>
    %416 = tpu.concatenate %410, %415 in 0 : vector<1x16xf32>, vector<1x16xf32> -> vector<2x16xf32>
    %cst_349 = arith.constant 0.000000e+00 : f32
    %417 = vector.broadcast %cst_349 : f32 to vector<2x16xf32>
    %418 = arith.cmpf oge, %416, %417 : vector<2x16xf32>
    %419 = vector.broadcast %405 : vector<1x1xf32> to vector<2x16xf32>
    %420 = arith.mulf %419, %416 : vector<2x16xf32>
    %421 = arith.select %418, %416, %420 : vector<2x16xi1>, vector<2x16xf32>
    %c18_350 = arith.constant 18 : index
    %c0_351 = arith.constant 0 : index
    %422 = vector.load %arg2[%c18_350, %c0_351] : memref<25x81xf32, #tpu.memory_space<vmem>>, vector<1x6xf32>
    %c18_352 = arith.constant 18 : index
    %c80_353 = arith.constant 80 : index
    %423 = vector.load %arg2[%c18_352, %c80_353] : memref<25x81xf32, #tpu.memory_space<vmem>>, vector<1x1xf32>
    %cst_354 = arith.constant dense<0.000000e+00> : vector<1x16xf32>
    %424 = tpu.matmul %422, %381, %cst_354 {dimension_numbers = #tpu.dot_dimension_numbers<[1], [0], [0], [1], [0, 0, 1, 1], [], []>} : vector<1x6xf32>, vector<6x16xf32>, vector<1x16xf32> -> vector<1x16xf32>
    %425 = vector.broadcast %423 : vector<1x1xf32> to vector<1x16xf32>
    %426 = arith.addf %424, %425 : vector<1x16xf32>
    %c19 = arith.constant 19 : index
    %c0_355 = arith.constant 0 : index
    %427 = vector.load %arg2[%c19, %c0_355] : memref<25x81xf32, #tpu.memory_space<vmem>>, vector<1x10xf32>
    %c19_356 = arith.constant 19 : index
    %c80_357 = arith.constant 80 : index
    %428 = vector.load %arg2[%c19_356, %c80_357] : memref<25x81xf32, #tpu.memory_space<vmem>>, vector<1x1xf32>
    %cst_358 = arith.constant dense<0.000000e+00> : vector<1x16xf32>
    %429 = tpu.matmul %427, %404, %cst_358 {dimension_numbers = #tpu.dot_dimension_numbers<[1], [0], [0], [1], [0, 0, 1, 1], [], []>} : vector<1x10xf32>, vector<10x16xf32>, vector<1x16xf32> -> vector<1x16xf32>
    %430 = vector.broadcast %428 : vector<1x1xf32> to vector<1x16xf32>
    %431 = arith.addf %429, %430 : vector<1x16xf32>
    %432 = tpu.concatenate %426, %431 in 0 : vector<1x16xf32>, vector<1x16xf32> -> vector<2x16xf32>
    %cst_359 = arith.constant 0.000000e+00 : f32
    %433 = vector.broadcast %cst_359 : f32 to vector<2x16xf32>
    %434 = arith.cmpf oge, %432, %433 : vector<2x16xf32>
    %435 = vector.broadcast %405 : vector<1x1xf32> to vector<2x16xf32>
    %436 = arith.mulf %435, %432 : vector<2x16xf32>
    %437 = arith.select %434, %432, %436 : vector<2x16xi1>, vector<2x16xf32>
    %438 = tpu.iota {dimensions = array<i32: 0>} : vector<8x16xi32>
    %439 = tpu.iota {dimensions = array<i32: 1>} : vector<8x16xi32>
    %c2_i32_360 = arith.constant 2 : i32
    %440 = vector.broadcast %c2_i32_360 : i32 to vector<8x16xi32>
    %441 = arith.muli %438, %440 : vector<8x16xi32>
    %c0_i32_361 = arith.constant 0 : i32
    %442 = vector.broadcast %c0_i32_361 : i32 to vector<8x16xi32>
    %443 = arith.addi %441, %442 : vector<8x16xi32>
    %444 = arith.cmpi eq, %439, %443 : vector<8x16xi32>
    %445 = arith.extui %444 : vector<8x16xi1> to vector<8x16xi32>
    %446 = arith.sitofp %445 : vector<8x16xi32> to vector<8x16xf32>
    %c2_i32_362 = arith.constant 2 : i32
    %447 = vector.broadcast %c2_i32_362 : i32 to vector<8x16xi32>
    %448 = arith.muli %438, %447 : vector<8x16xi32>
    %c1_i32_363 = arith.constant 1 : i32
    %449 = vector.broadcast %c1_i32_363 : i32 to vector<8x16xi32>
    %450 = arith.addi %448, %449 : vector<8x16xi32>
    %451 = arith.cmpi eq, %439, %450 : vector<8x16xi32>
    %452 = arith.extui %451 : vector<8x16xi1> to vector<8x16xi32>
    %453 = arith.sitofp %452 : vector<8x16xi32> to vector<8x16xf32>
    %454 = vector.extract_strided_slice %421 {offsets = [0, 0], sizes = [2, 8], strides = [1, 1]} : vector<2x16xf32> to vector<2x8xf32>
    %cst_364 = arith.constant dense<0.000000e+00> : vector<2x16xf32>
    %455 = tpu.matmul %454, %446, %cst_364 {dimension_numbers = #tpu.dot_dimension_numbers<[1], [0], [0], [1], [0, 0, 1, 1], [], []>} : vector<2x8xf32>, vector<8x16xf32>, vector<2x16xf32> -> vector<2x16xf32>
    %456 = vector.extract_strided_slice %437 {offsets = [0, 0], sizes = [2, 8], strides = [1, 1]} : vector<2x16xf32> to vector<2x8xf32>
    %cst_365 = arith.constant dense<0.000000e+00> : vector<2x16xf32>
    %457 = tpu.matmul %456, %453, %cst_365 {dimension_numbers = #tpu.dot_dimension_numbers<[1], [0], [0], [1], [0, 0, 1, 1], [], []>} : vector<2x8xf32>, vector<8x16xf32>, vector<2x16xf32> -> vector<2x16xf32>
    %458 = arith.addf %455, %457 : vector<2x16xf32>
    %c0_366 = arith.constant 0 : index
    %c0_367 = arith.constant 0 : index
    %c2_368 = arith.constant 2 : index
    %459 = vector.load %arg4[%c0_366, %c0_367, %c2_368] : memref<2x16x20xf32, #tpu.memory_space<vmem>>, vector<1x2x16xf32>
    %460 = vector.shape_cast %459 : vector<1x2x16xf32> to vector<2x16xf32>
    %461 = vector.shape_cast %458 : vector<2x16xf32> to vector<1x2x16xf32>
    tpu.vector_store %arg4[%c0_366, %c0_367, %c2_368], %461 {strides = array<i32>} : memref<2x16x20xf32, #tpu.memory_space<vmem>>, vector<1x2x16xf32>,
    %462 = vector.extract_strided_slice %421 {offsets = [0, 8], sizes = [2, 8], strides = [1, 1]} : vector<2x16xf32> to vector<2x8xf32>
    %cst_369 = arith.constant dense<0.000000e+00> : vector<2x16xf32>
    %463 = tpu.matmul %462, %446, %cst_369 {dimension_numbers = #tpu.dot_dimension_numbers<[1], [0], [0], [1], [0, 0, 1, 1], [], []>} : vector<2x8xf32>, vector<8x16xf32>, vector<2x16xf32> -> vector<2x16xf32>
    %464 = vector.extract_strided_slice %437 {offsets = [0, 8], sizes = [2, 8], strides = [1, 1]} : vector<2x16xf32> to vector<2x8xf32>
    %cst_370 = arith.constant dense<0.000000e+00> : vector<2x16xf32>
    %465 = tpu.matmul %464, %453, %cst_370 {dimension_numbers = #tpu.dot_dimension_numbers<[1], [0], [0], [1], [0, 0, 1, 1], [], []>} : vector<2x8xf32>, vector<8x16xf32>, vector<2x16xf32> -> vector<2x16xf32>
    %466 = arith.addf %463, %465 : vector<2x16xf32>
    %c1_371 = arith.constant 1 : index
    %c0_372 = arith.constant 0 : index
    %c2_373 = arith.constant 2 : index
    %467 = vector.load %arg4[%c1_371, %c0_372, %c2_373] : memref<2x16x20xf32, #tpu.memory_space<vmem>>, vector<1x2x16xf32>
    %468 = vector.shape_cast %467 : vector<1x2x16xf32> to vector<2x16xf32>
    %469 = vector.shape_cast %466 : vector<2x16xf32> to vector<1x2x16xf32>
    tpu.vector_store %arg4[%c1_371, %c0_372, %c2_373], %469 {strides = array<i32>} : memref<2x16x20xf32, #tpu.memory_space<vmem>>, vector<1x2x16xf32>,
    %cst_374 = arith.constant 0.000000e+00 : f32
    %470 = vector.broadcast %cst_374 : f32 to vector<2x2xf32>
    %c0_375 = arith.constant 0 : index
    %c0_376 = arith.constant 0 : index
    %c0_377 = arith.constant 0 : index
    %471 = vector.load %arg4[%c0_375, %c0_376, %c0_377] : memref<2x16x20xf32, #tpu.memory_space<vmem>>, vector<1x2x2xf32>
    %472 = vector.shape_cast %471 : vector<1x2x2xf32> to vector<2x2xf32>
    %473 = vector.shape_cast %470 : vector<2x2xf32> to vector<1x2x2xf32>
    tpu.vector_store %arg4[%c0_375, %c0_376, %c0_377], %473 {strides = array<i32>} : memref<2x16x20xf32, #tpu.memory_space<vmem>>, vector<1x2x2xf32>,
    %c0_378 = arith.constant 0 : index
    %c0_379 = arith.constant 0 : index
    %c18_380 = arith.constant 18 : index
    %474 = vector.load %arg4[%c0_378, %c0_379, %c18_380] : memref<2x16x20xf32, #tpu.memory_space<vmem>>, vector<1x2x2xf32>
    %475 = vector.shape_cast %474 : vector<1x2x2xf32> to vector<2x2xf32>
    %476 = vector.shape_cast %470 : vector<2x2xf32> to vector<1x2x2xf32>
    tpu.vector_store %arg4[%c0_378, %c0_379, %c18_380], %476 {strides = array<i32>} : memref<2x16x20xf32, #tpu.memory_space<vmem>>, vector<1x2x2xf32>,
    %c1_381 = arith.constant 1 : index
    %c0_382 = arith.constant 0 : index
    %c0_383 = arith.constant 0 : index
    %477 = vector.load %arg4[%c1_381, %c0_382, %c0_383] : memref<2x16x20xf32, #tpu.memory_space<vmem>>, vector<1x2x2xf32>
    %478 = vector.shape_cast %477 : vector<1x2x2xf32> to vector<2x2xf32>
    %479 = vector.shape_cast %470 : vector<2x2xf32> to vector<1x2x2xf32>
    tpu.vector_store %arg4[%c1_381, %c0_382, %c0_383], %479 {strides = array<i32>} : memref<2x16x20xf32, #tpu.memory_space<vmem>>, vector<1x2x2xf32>,
    %c1_384 = arith.constant 1 : index
    %c0_385 = arith.constant 0 : index
    %c18_386 = arith.constant 18 : index
    %480 = vector.load %arg4[%c1_384, %c0_385, %c18_386] : memref<2x16x20xf32, #tpu.memory_space<vmem>>, vector<1x2x2xf32>
    %481 = vector.shape_cast %480 : vector<1x2x2xf32> to vector<2x2xf32>
    %482 = vector.shape_cast %470 : vector<2x2xf32> to vector<1x2x2xf32>
    tpu.vector_store %arg4[%c1_384, %c0_385, %c18_386], %482 {strides = array<i32>} : memref<2x16x20xf32, #tpu.memory_space<vmem>>, vector<1x2x2xf32>,
    %c0_387 = arith.constant 0 : index
    %c0_388 = arith.constant 0 : index
    %c1_389 = arith.constant 1 : index
    %483 = vector.load %arg4[%c0_387, %c0_388, %c1_389] : memref<2x16x20xf32, #tpu.memory_space<vmem>>, vector<1x2x16xf32>
    %484 = vector.shape_cast %483 : vector<1x2x16xf32> to vector<2x16xf32>
    %c0_390 = arith.constant 0 : index
    %c0_391 = arith.constant 0 : index
    %c2_392 = arith.constant 2 : index
    %485 = vector.load %arg4[%c0_390, %c0_391, %c2_392] : memref<2x16x20xf32, #tpu.memory_space<vmem>>, vector<1x2x16xf32>
    %486 = vector.shape_cast %485 : vector<1x2x16xf32> to vector<2x16xf32>
    %c0_393 = arith.constant 0 : index
    %c0_394 = arith.constant 0 : index
    %c3_395 = arith.constant 3 : index
    %487 = vector.load %arg4[%c0_393, %c0_394, %c3_395] : memref<2x16x20xf32, #tpu.memory_space<vmem>>, vector<1x2x16xf32>
    %488 = vector.shape_cast %487 : vector<1x2x16xf32> to vector<2x16xf32>
    %489 = tpu.concatenate %484, %486, %488 in 0 : vector<2x16xf32>, vector<2x16xf32>, vector<2x16xf32> -> vector<6x16xf32>
    %c1_396 = arith.constant 1 : index
    %c0_397 = arith.constant 0 : index
    %c1_398 = arith.constant 1 : index
    %490 = vector.load %arg4[%c1_396, %c0_397, %c1_398] : memref<2x16x20xf32, #tpu.memory_space<vmem>>, vector<1x2x16xf32>
    %491 = vector.shape_cast %490 : vector<1x2x16xf32> to vector<2x16xf32>
    %c1_399 = arith.constant 1 : index
    %c0_400 = arith.constant 0 : index
    %c2_401 = arith.constant 2 : index
    %492 = vector.load %arg4[%c1_399, %c0_400, %c2_401] : memref<2x16x20xf32, #tpu.memory_space<vmem>>, vector<1x2x16xf32>
    %493 = vector.shape_cast %492 : vector<1x2x16xf32> to vector<2x16xf32>
    %c1_402 = arith.constant 1 : index
    %c0_403 = arith.constant 0 : index
    %c3_404 = arith.constant 3 : index
    %494 = vector.load %arg4[%c1_402, %c0_403, %c3_404] : memref<2x16x20xf32, #tpu.memory_space<vmem>>, vector<1x2x16xf32>
    %495 = vector.shape_cast %494 : vector<1x2x16xf32> to vector<2x16xf32>
    %496 = tpu.concatenate %491, %493, %495 in 0 : vector<2x16xf32>, vector<2x16xf32>, vector<2x16xf32> -> vector<6x16xf32>
    %497 = tpu.concatenate %489, %496 in 1 : vector<6x16xf32>, vector<6x16xf32> -> vector<6x32xf32>
    %c20 = arith.constant 20 : index
    %c0_405 = arith.constant 0 : index
    %498 = vector.load %arg2[%c20, %c0_405] : memref<25x81xf32, #tpu.memory_space<vmem>>, vector<1x6xf32>
    %c20_406 = arith.constant 20 : index
    %c80_407 = arith.constant 80 : index
    %499 = vector.load %arg2[%c20_406, %c80_407] : memref<25x81xf32, #tpu.memory_space<vmem>>, vector<1x1xf32>
    %cst_408 = arith.constant dense<0.000000e+00> : vector<1x32xf32>
    %500 = tpu.matmul %498, %497, %cst_408 {dimension_numbers = #tpu.dot_dimension_numbers<[1], [0], [0], [1], [0, 0, 1, 1], [], []>} : vector<1x6xf32>, vector<6x32xf32>, vector<1x32xf32> -> vector<1x32xf32>
    %501 = vector.broadcast %499 : vector<1x1xf32> to vector<1x32xf32>
    %502 = arith.addf %500, %501 : vector<1x32xf32>
    %c0_409 = arith.constant 0 : index
    %c0_410 = arith.constant 0 : index
    %c0_411 = arith.constant 0 : index
    %503 = vector.load %arg3[%c0_409, %c0_410, %c0_411] : memref<1x1x32xf32, #tpu.memory_space<vmem>>, vector<1x1x32xf32>
    %504 = vector.shape_cast %503 : vector<1x1x32xf32> to vector<1x32xf32>
    %505 = vector.shape_cast %502 : vector<1x32xf32> to vector<1x1x32xf32>
    tpu.vector_store %arg3[%c0_409, %c0_410, %c0_411], %505 {strides = array<i32>} : memref<1x1x32xf32, #tpu.memory_space<vmem>>, vector<1x1x32xf32>,
    return
  }
  func.func @transform_0(%arg0: i32) -> (i32, i32, i32) {
    %c0_i32 = arith.constant 0 : i32
    %c0_i32_0 = arith.constant 0 : i32
    %c0_i32_1 = arith.constant 0 : i32
    return %arg0, %c0_i32, %c0_i32_0 : i32, i32, i32
  }
  func.func @transform_1(%arg0: i32) -> (i32, i32) {
    %c0_i32 = arith.constant 0 : i32
    %c0_i32_0 = arith.constant 0 : i32
    %c0_i32_1 = arith.constant 0 : i32
    return %c0_i32, %c0_i32_0 : i32, i32
  }
  func.func @transform_2(%arg0: i32) -> (i32, i32, i32) {
    %c0_i32 = arith.constant 0 : i32
    %c0_i32_0 = arith.constant 0 : i32
    %c0_i32_1 = arith.constant 0 : i32
    return %arg0, %c0_i32, %c0_i32_0 : i32, i32, i32
  }
}

</mosaic_0001>

<bundles_post_ra>
// kernel: autoencoder_forward.1
= control target key start
LH: loop header
LB: loop body
LE: loop exit
PB: predicated region body
PF: predicated region fallthrough
CT: control target
= control target key end

     0   :  { %s3620_s9 = smov 0   ;;  %s4097_s0 = inlined_call_operand.vmem [shape: f32[2,1,32], index: 0, kind: input, shape index: {}]   ;;  %s4098_s1 = inlined_call_operand.vmem [shape: f32[25,81], index: 1, kind: input, shape index: {}]   ;;  %s4099_s2 = inlined_call_operand.vmem [shape: f32[2,1,32], index: 2, kind: output, shape index: {}]  }
   0x1 LB: > { %s2947_s10 = sadd.s32 4294967295, %s3582_s9   ;;  %p2951_p0 = scmp.ge.s32.totalorder %s3582_s9, 1  ;;  %s3582_s9 = sphi %s3620_s9, %s12_s9  }
   0x2   : > { %p110_p1 = scmp.lt.s32.totalorder %s3582_s9, 3 }
   0x4   : > { %p111_p2 = pnand %p2951_p0, %p110_p1 }
   0x5   : > { %p128_p3 = scmp.lt.s32.totalorder (!%p111_p2), %s2947_s10, 1  ;;  %v3584_v0 = vmov (!%p111_p2), 0.0   ;;  %s3585_s14 = smov (!%p111_p2), 114   ;;  %vm143_vm0 = vcmask (!%p111_p2), 139280   ;;  %vm150_vm1 = vcmask (!%p111_p2), 8192   ;;  %vm152_vm2 = vcmask (!%p111_p2), 155792  }
   0x6   : > { %114 = sbr.rel (%p111_p2) target bundleno = 4323 (0x10e3), region = 28  ;;  %3122 = vmatprep.subr.mxu1 (!%p111_p2), %v3584_v0  ;;  %3117 = vmatprep.subr.mxu0 (!%p111_p2), %v3584_v0  ;;  %s3586_s15 = smov (!%p111_p2), 2   ;;  %vm3591_vm3 = vmmov (!%p111_p2), 0   ;;  %vm166_vm4 = vcmask (!%p111_p2), 1040384   ;;  %vm168_vm5 = vcmask (!%p111_p2), 1041408   ;;  %v3592_v19 = vmov (!%p111_p2), 80  }
   0x7   : > { %s3587_s16 = smov (!%p111_p2), 127   ;;  %s3588_s17 = smov (!%p111_p2), 125   ;;  %3124 = vmatprep.mubr.msk.f32.mxu1 (!%p111_p2), %vm3591_vm3, %v3584_v0  ;;  %3119 = vmatprep.mubr.msk.f32.mxu0 (!%p111_p2), %vm3591_vm3, %v3584_v0  ;;  %v219_v16 = vld [vmem:[%s4098_s1 + $0x15] sm:$0x1] (!%p111_p2)  ;;  %vm200_vm6 = vcmask (!%p111_p2), 1042432   ;;  %vm202_vm7 = vcmask (!%p111_p2), 1043456   ;;  %v396_v39 = vlaneseq (!%p111_p2) }
   0x8   : > { %s3589_s18 = smov (!%p111_p2), 126   ;;  %s3590_s19 = smov (!%p111_p2), 124   ;;  %3464 = vset.pattern.permute.xlu1 (!%p111_p2), %v3592_v19  ;;  %3465 = vset.pattern.permute.xlu0 (!%p111_p2), %v3592_v19  ;;  %3427 = vpush (!%p111_p2), %v219_v16  ;;  %v302_v28 = vld [vmem:[%s4098_s1 + $0x2] sm:$0x3] (!%p111_p2)  ;;  %v220_v29 = vld [vmem:[%s4098_s1] sm:$0x3] (!%p111_p2) }
   0x9   : > { %s3593_s22 = smov (!%p111_p2), 16   ;;  %s3594_s23 = smov (!%p111_p2), 15   ;;  %vm190_vm8 = vcmask (!%p111_p2), 130048   ;;  %vm311_vm9 = vcmask (!%p111_p2), 1044480   ;;  %vm308_vm10 = vcmask (!%p111_p2), 39936   ;;  %vm226_vm11 = vcmask (!%p111_p2), 23552  }
   0xa   : > { %v3679_v40 = vand.u32 (!%p111_p2), 127, %v396_v39  ;;  %v3684_v42 = vshrl.u32 (!%p111_p2), %v396_v39, 7  ;;  %v3595_v46 = vmov (!%p111_p2), 0.0|0.0   ;;  %v3596_v47 = vmov (!%p111_p2), 1.0|1.0   ;;  %s3597_s29 = smov (!%p111_p2), 112  }
   0xb   : > { %s3598_s30 = smov (!%p111_p2), 8   ;;  %s3599_s3 = smov (!%p111_p2), 7  }
   0xc   : > { %v3682_v41 = vmul.u32 (!%p111_p2), 2, %v3679_v40  ;;  %v398_v44 = vadd.s32 (!%p111_p2), 8, %v3684_v42  ;;  %s3603_s20 = smov (!%p111_p2), 3  }
   0xd   : > { %s4103_s10 = smov (!%p128_p3, %s2947_s10), 1 }
   0xe   : > { %s130_s13 = scalar_lea.vmem %s4097_s0, %s4103_s10  ;;  %v403_v43 = vsub.s32 30, %v3682_v41  ;;  %vm402_vm12 = vcmp.ge.s32.totalorder %v3682_v41, 16  ;;  %v3696_v48 = vadd.s32 1, %v3682_v41 }
   0xf   : > { %v2952_v1 = vld [vmem:[%s130_s13] ss:$0 sm:$0xff]  ;;  %s3601_s13 = smov 120  }
  0x10   : > { %145 = vrot.lane.b32.xlu0 %v2952_v1, %s3585_s14  ;;  %v404_v45 = vsel %vm402_vm12, %v403_v43, %v3682_v41  ;;  %v571_v50 = vsub.s32 30, %v3696_v48  ;;  %vm731_vm12 = vcmask 97360   ;;  %s3602_s14 = smov 4  }
  0x11   : > { %vm405_vm13 = vcmp.eq.s32.totalorder %v3684_v42, %v404_v45  ;;  %vm406_vm14 = vcmp.eq.s32.totalorder %v398_v44, %v404_v45 }
  0x12   : > { %vm3343_vm15 = vmpackc.low %vm406_vm14, %vm405_vm13  ;;  %vm763_vm13 = vcmask 64512   ;;  %vm884_vm14 = vcmask 326656  }
  0x14   : > { %140 = vrot.lane.b32.xlu0 %v2952_v1, %s3586_s15 }
  0x39   : > { %s3428_s28 = spop %3427 }
  0x3a   : > { %v392_v60 = vstv %s3428_s28 }
  0x82   : > { %v146_v2 = vpop.permute.xlu0 %145 }
  0x83   : > { %149 = vst.msk [vmem:[#allocation2 + $0x10] sm:$0x1] %vm143_vm0, %v146_v2 }
  0x84   : > { %154 = vst.msk [vmem:[#allocation2 + $0x10] sm:$0x1] %vm150_vm1, %v3584_v0 }
  0x85   : > { %155 = vst.msk [vmem:[#allocation2 + $0x10] sm:$0x1] %vm152_vm2, %v3584_v0 }
  0x86   : > { %v141_v3 = vpop.permute.xlu0 %140 }
  0x87   : > { %144 = vst.msk [vmem:[#allocation2] sm:$0x1] %vm143_vm0, %v141_v3  ;;  %vm570_vm0 = vcmp.ge.s32.totalorder %v3696_v48, 16 }
  0x88   : > { %151 = vst.msk [vmem:[#allocation2] sm:$0x1] %vm150_vm1, %v3584_v0  ;;  %v572_v56 = vsel %vm570_vm0, %v571_v50, %v3696_v48  ;;  %vm968_vm0 = vcmp.ge.s32.totalorder %v3682_v41, 8 }
  0x89   : > { %153 = vst.msk [vmem:[#allocation2] sm:$0x1] %vm152_vm2, %v3584_v0  ;;  %vm573_vm1 = vcmp.eq.s32.totalorder %v3684_v42, %v572_v56  ;;  %vm574_vm2 = vcmp.eq.s32.totalorder %v398_v44, %v572_v56 }
  0x8c   : > { %v170_v4 = vld [vmem:[#allocation2 + $0x10] sm:$0x1] }
  0x8d   : > { %v172_v5 = vrot.slane %v170_v4, 7  ;;  %v204_v6 = vrot.slane %v170_v4, 5  ;;  %v176_v7 = vrot.slane %v170_v4, 6  ;;  %v208_v10 = vrot.slane %v170_v4, 4 }
  0x8f   : > { %173 = vrot.lane.b32.xlu1 %v172_v5, %s3587_s16  ;;  %205 = vrot.lane.b32.xlu0 %v204_v6, %s3588_s17 }
  0x90   : > { %v156_v8 = vld [vmem:[#allocation2] sm:$0x1] }
  0x91   : > { %v158_v9 = vrot.slane %v156_v8, 7  ;;  %v192_v11 = vrot.slane %v156_v8, 5  ;;  %v162_v12 = vrot.slane %v156_v8, 6  ;;  %v196_v13 = vrot.slane %v156_v8, 4 }
  0x93   : > { %177 = vrot.lane.b32.xlu1 %v176_v7, %s3589_s18  ;;  %159 = vrot.lane.b32.xlu0 %v158_v9, %s3587_s16 }
  0x97   : > { %209 = vrot.lane.b32.xlu1 %v208_v10, %s3590_s19  ;;  %193 = vrot.lane.b32.xlu0 %v192_v11, %s3588_s17 }
  0x9b   : > { %163 = vrot.lane.b32.xlu1 %v162_v12, %s3589_s18 }
  0x9f   : > { %197 = vrot.lane.b32.xlu1 %v196_v13, %s3590_s19 }
 0x101   : > { %v174_v14 = vpop.permute.xlu1 %173  ;;  %v206_v15 = vpop.permute.xlu0 %205 }
 0x102   : > { %v180_v17 = vsel %vm166_vm4, %v170_v4, %v174_v14 }
 0x105   : > { %v178_v18 = vpop.permute.xlu1 %177  ;;  %v160_v23 = vpop.permute.xlu0 %159 }
 0x106   : > { %v181_v20 = vsel %vm168_vm5, %v180_v17, %v178_v18  ;;  %v167_v25 = vsel %vm166_vm4, %v156_v8, %v160_v23 }
 0x107   : > { %v212_v21 = vsel %vm200_vm6, %v181_v20, %v206_v15 }
 0x109   : > { %v210_v22 = vpop.permute.xlu1 %209  ;;  %v194_v30 = vpop.permute.xlu0 %193 }
 0x10a   : > { %v213_v24 = vsel %vm202_vm7, %v212_v21, %v210_v22 }
 0x10b   : > { %215 = vrot.lane.b32.xlu0 %v213_v24, %s3593_s22  ;;  %v878_v24 = vld [vmem:[%s4098_s1 + $0x8] sm:$0xf]  ;;  %s133_s22 = scalar_lea.vmem %s4099_s2, %s4103_s10 }
 0x10d   : > { %v164_v26 = vpop.permute.xlu1 %163 }
 0x10e   : > { %v169_v27 = vsel %vm168_vm5, %v167_v25, %v164_v26  ;;  %v799_v25 = vld [vmem:[%s4098_s1 + $0x4] sm:$0xf]  ;;  %v798_v26 = vld [vmem:[%s4098_s1 + $0x16] sm:$0x1] }
 0x10f   : > { %187 = vrot.lane.b32.xlu0 %v181_v20, %s3594_s23  ;;  %183 = vrot.lane.b32.xlu1 %v169_v27, %s3587_s16  ;;  %v201_v32 = vsel %vm200_vm6, %v169_v27, %v194_v30  ;;  %3429 = vpush %v798_v26 }
 0x111   : > { %v198_v31 = vpop.permute.xlu1 %197 }
 0x112   : > { %v203_v33 = vsel %vm202_vm7, %v201_v32, %v198_v31 }
 0x113   : > { %305 = vperm.xlu1 %3464, %v302_v28   ;;  %223 = vperm.xlu0 %3465, %v220_v29  }
 0x140   : > { %s3430_s12 = spop %3429 }
 0x17d   : > { %v216_v34 = vpop.permute.xlu0 %215 }
 0x17e   : > { %v218_v35 = vsel %vm190_vm8, %v203_v33, %v216_v34 }
 0x17f   : > { %3123 = vmatpush3.msk.msra.mxu1 %vm311_vm9, %v218_v35  ;;  %vm3349_vm9 = vmpackc.low %vm574_vm2, %vm573_vm1  ;;  %vm1132_vm1 = vcmp.ge.s32.totalorder %v3696_v48, 8 }
 0x180   : > { %3125 = vmatmul.mubr.msk.f32.vlgmr.msra.gmra.mrb[0].mxu1 %vm308_vm10, %v302_v28  ;;  %3345 = vmatprep.subr.bf16.mxu1 %v3595_v46  ;;  %vm488_vm10 = vcmask 76816  }
 0x181   : > { %v184_v36 = vpop.permute.xlu1 %183  ;;  %v188_v37 = vpop.permute.xlu0 %187  ;;  %3138 = vmatprep.mubr.msk.f32.mxu1 %vm3591_vm3, %v3584_v0  ;;  %3347 = vmatpush3.bf16.msk.msra.mxu1 %vm3343_vm15, %v3596_v47 }
 0x182   : > { %v191_v38 = vsel %vm190_vm8, %v184_v36, %v188_v37  ;;  %3351 = vmatprep.subr.bf16.mxu1 %v3595_v46 }
 0x183   : > { %3118 = vmatpush3.msk.msra.mxu0 %vm200_vm6, %v191_v38 }
 0x184   : > { %3120 = vmatmul.mubr.msk.f32.vlgmr.msra.gmra.mrb[0].mxu0 %vm226_vm11, %v220_v29  ;;  %3342 = vmatprep.subr.bf16.mxu0 %v3595_v46  ;;  %vm729_vm11 = vcmask 15360  }
 0x185   : > { %3131 = vmatprep.mubr.msk.f32.mxu0 %vm3591_vm3, %v3584_v0  ;;  %3344 = vmatpush3.bf16.msk.msra.mxu0 %vm3343_vm15, %v3596_v47  ;;  %vm805_vm15 = vcmask 195584  }
 0x186   : > { %3348 = vmatprep.subr.bf16.mxu0 %v3595_v46 }
 0x192   : > { %v306_v49 = vpop.permute.xlu1 %305  ;;  %v224_v54 = vpop.permute.xlu0 %223 }
 0x253   : > { %v381_v51 = vpop.f32.mrb[0].mxu1 }
 0x254   : > { %v382_v52 = vadd.f32 %v381_v51, %v306_v49  ;;  %v3126_v53 = vpop.f32.mrb[1].mxu1 }
 0x256   : > { %v386_v55 = vrot.slane %v382_v52, 6 }
 0x257   : > { %v298_v57 = vpop.f32.mrb[0].mxu0 }
 0x258   : > { %v299_v58 = vadd.f32 %v298_v57, %v224_v54  ;;  %v3121_v59 = vpop.f32.mrb[1].mxu0 }
 0x259   : > { %v1133_v59 = vsub.s32 14, %v3696_v48 }
 0x25a   : > { %v388_v61 = vsel %vm168_vm5, %v299_v58, %v386_v55  ;;  %v969_v58 = vsub.s32 14, %v3682_v41 }
 0x25b   : > { %v394_v62 = vmul.f32 %v392_v60, %v388_v61  ;;  %vm389_vm6 = vcmp.ge.f32.partialorder %v388_v61, 0.0 }
 0x25c   : > { %v970_v60 = vsel %vm968_vm0, %v969_v58, %v3682_v41 }
 0x25d   : > { %v395_v63 = vsel %vm389_vm6, %v388_v61, %v394_v62  ;;  %v1134_v61 = vsel %vm1132_vm1, %v1133_v59, %v3696_v48  ;;  %vm971_vm2 = vcmp.eq.s32.totalorder %v3684_v42, %v970_v60  ;;  %v3600_v62 = vmov 1.0  }
 0x25e   : > { %490 = vrot.lane.b32.xlu1 %v395_v63, %s3597_s29  ;;  %3132 = vmatmul.mubr.msk.f32.vlgmr.msra.gmra.mrb[2].mxu0 %vm190_vm8, %v395_v63  ;;  %vm1135_vm6 = vcmp.eq.s32.totalorder %v3684_v42, %v1134_v61 }
 0x25f   : > { %3350 = vmatpush3.bf16.msk.msra.mxu0 %vm3349_vm9, %v3596_v47  ;;  %3145 = vmatprep.mubr.msk.f32.mxu0 %vm3591_vm3, %v3584_v0 }
 0x260   : > { %3354 = vmatprep.subr.bf16.mxu0 %v3595_v46 }
 0x262   : > { %3146 = vmatmul.mubr.msk.f32.vlgmr.msra.gmra.mrb[4].mxu0 %vm190_vm8, %v395_v63 }
 0x263   : > { %3161 = vmatprep.mubr.msk.f32.mxu0 %vm3591_vm3, %v3584_v0 }
 0x2d0   : > { %v491_v1 = vpop.permute.xlu1 %490 }
 0x2d1   : > { %3139 = vmatmul.mubr.msk.f32.vlgmr.msra.gmra.mrb[2].mxu1 %vm190_vm8, %v491_v1 }
 0x2d2   : > { %3353 = vmatpush3.bf16.msk.msra.mxu1 %vm3349_vm9, %v3596_v47  ;;  %3152 = vmatprep.mubr.msk.f32.mxu1 %vm3591_vm3, %v3584_v0 }
 0x2d3   : > { %3357 = vmatprep.subr.bf16.mxu1 %v3595_v46 }
 0x2d5   : > { %3153 = vmatmul.mubr.msk.f32.vlgmr.msra.gmra.mrb[4].mxu1 %vm190_vm8, %v491_v1 }
 0x2d6   : > { %3174 = vmatprep.mubr.msk.f32.mxu1 %vm3591_vm3, %v3584_v0 }
 0x331   : > { %v480_v2 = vpop.f32.mrb[2].mxu0 }
 0x332   : > { %v3133_v3 = vpop.f32.mrb[3].mxu0 }
 0x335   : > { %v645_v4 = vpop.f32.mrb[4].mxu0 }
 0x336   : > { %v3147_v5 = vpop.f32.mrb[5].mxu0 }
 0x3a4   : > { %v560_v6 = vpop.f32.mrb[2].mxu1 }
 0x3a5   : > { %565 = vrot.lane.b32.xlu1 %v560_v6, %s3586_s15  ;;  %v3140_v7 = vpop.f32.mrb[3].mxu1 }
 0x3a6   : > { %v964_v7 = vstv %s3430_s12 }
 0x3a8   : > { %v720_v8 = vpop.f32.mrb[4].mxu1 }
 0x3a9   : > { %725 = vrot.lane.b32.xlu0 %v720_v8, %s3586_s15  ;;  %v3154_v9 = vpop.f32.mrb[5].mxu1  ;;  %485 = vrot.lane.b32.xlu1 %v480_v2, %s3586_s15 }
 0x3ad   : > { %650 = vrot.lane.b32.xlu0 %v645_v4, %s3586_s15 }
 0x417   : > { %v566_v10 = vpop.permute.xlu1 %565 }
 0x418   : > { %568 = vst.msk [vmem:[#allocation2 + $0x10] sm:$0xf] %vm488_vm10, %v566_v10 }
 0x41b   : > { %v726_v11 = vpop.permute.xlu0 %725  ;;  %v486_v12 = vpop.permute.xlu1 %485 }
 0x41c   : > { %728 = vst.msk [vmem:[#allocation2 + $0x14] sm:$0xf] %vm488_vm10, %v726_v11  ;;  %489 = vst.msk [vmem:[#allocation2] sm:$0xf] %vm488_vm10, %v486_v12 }
 0x41d   : > { %733 = vst.msk [vmem:[#allocation2 + $0x10] sm:$0xff] %vm729_vm11, %v3584_v0 }
 0x41e   : > { %734 = vst.msk [vmem:[#allocation2 + $0x10] sm:$0xff] %vm731_vm12, %v3584_v0 }
 0x41f   : > { %v651_v13 = vpop.permute.xlu0 %650 }
 0x420   : > { %653 = vst.msk [vmem:[#allocation2 + $0x4] sm:$0xf] %vm488_vm10, %v651_v13  ;;  %vm1051_vm10 = vcmask 48144  }
 0x421   : > { %730 = vst.msk [vmem:[#allocation2] sm:$0xff] %vm729_vm11, %v3584_v0 }
 0x422   : > { %732 = vst.msk [vmem:[#allocation2] sm:$0xff] %vm731_vm12, %v3584_v0  ;;  %vm1290_vm12 = vcmask 64560  }
 0x425   : > { %v741_v14 = vld [vmem:[#allocation2 + $0x10] sm:$0xff] }
 0x426   : > { %743 = vrot.lane.b32.xlu1 %v741_v14, %s3587_s16  ;;  %745 = vrot.lane.b32.xlu0 %v741_v14, %s3589_s18 }
 0x429   : > { %v735_v15 = vld [vmem:[#allocation2] sm:$0xff] }
 0x42a   : > { %774 = vrot.lane.b32.xlu1 %v741_v14, %s3588_s17  ;;  %737 = vrot.lane.b32.xlu0 %v735_v15, %s3587_s16 }
 0x42e   : > { %739 = vrot.lane.b32.xlu0 %v735_v15, %s3589_s18  ;;  %776 = vrot.lane.b32.xlu1 %v741_v14, %s3590_s19 }
 0x432   : > { %768 = vrot.lane.b32.xlu0 %v735_v15, %s3588_s17 }
 0x498   : > { %v744_v16 = vpop.permute.xlu1 %743  ;;  %v746_v17 = vpop.permute.xlu0 %745 }
 0x499   : > { %v3466_v18 = vpack.i.bf16 %v744_v16, %v741_v14 }
 0x49b   : > { %3467 = vrot.lane.b32.xlu1 %v3466_v18, %s3598_s30 }
 0x49c   : > { %v775_v19 = vpop.permute.xlu1 %774  ;;  %v738_v20 = vpop.permute.xlu0 %737 }
 0x49d   : > { %v3471_v21 = vpack.i.bf16 %v775_v19, %v746_v17  ;;  %747 = vrot.lane.b32.xlu0 %v738_v20, %s3587_s16 }
 0x49f   : > { %3472 = vrot.lane.b32.xlu1 %v3471_v21, %s3598_s30 }
 0x4a0   : > { %v740_v22 = vpop.permute.xlu0 %739  ;;  %v777_v23 = vpop.permute.xlu1 %776 }
 0x4a1   : > { %771 = vrot.lane.b32.xlu0 %v735_v15, %s3590_s19 }
 0x4a3   : > { %3477 = vrot.lane.b32.xlu1 %v3466_v18, %s3599_s3 }
 0x4a4   : > { %v769_v27 = vpop.permute.xlu0 %768 }
 0x4a5   : > { %749 = vrot.lane.b32.xlu0 %v740_v22, %s3587_s16 }
 0x4a7   : > { %786 = vrot.lane.b32.xlu1 %v777_v23, %s3598_s30 }
 0x4a9   : > { %881 = vperm.xlu0 %3465, %v878_v24  }
 0x4ab   : > { %758 = vrot.lane.b32.xlu1 %v746_v17, %s3599_s3 }
 0x4af   : > { %802 = vperm.xlu1 %3464, %v799_v25  }
 0x50d   : > { %v3468_v28 = vpop.permute.xlu1 %3467 }
 0x50e   : > { %v3470_v29 = vunpack.i.h.bf16 %v3468_v28  ;;  %v3469_v30 = vunpack.i.l.bf16 %v3468_v28 }
 0x50f   : > { %v748_v31 = vpop.permute.xlu0 %747 }
 0x510   : > { %v793_v32 = vsel %vm763_vm13, %v735_v15, %v3469_v30  ;;  %v794_v33 = vsel %vm763_vm13, %v738_v20, %v3470_v29 }
 0x511   : > { %v3358_v34 = vpack.c.bf16 %v794_v33, %v793_v32  ;;  %v3473_v35 = vpop.permute.xlu1 %3472 }
 0x512   : > { %v3475_v36 = vunpack.i.h.bf16 %v3473_v35  ;;  %v3474_v37 = vunpack.i.l.bf16 %v3473_v35 }
 0x513   : > { %3359 = vmatpush3.bf16.msra.mxu1 %v3358_v34  ;;  %v772_v45 = vpop.permute.xlu0 %771 }
 0x514   : > { %v795_v38 = vsel %vm763_vm13, %v740_v22, %v3474_v37  ;;  %v796_v39 = vsel %vm763_vm13, %v769_v27, %v3475_v36  ;;  %3360 = vmatprep.subr.bf16.mxu1 %v3595_v46 }
 0x515   : > { %v3361_v43 = vpack.c.bf16 %v796_v39, %v795_v38  ;;  %v3478_v44 = vpop.permute.xlu1 %3477 }
 0x516   : > { %v3480_v47 = vunpack.i.h.bf16 %v3478_v44  ;;  %v3479_v49 = vunpack.i.l.bf16 %v3478_v44 }
 0x517   : > { %3362 = vmatpush3.bf16.msra.mxu1 %v3361_v43  ;;  %v750_v55 = vpop.permute.xlu0 %749 }
 0x518   : > { %v764_v50 = vsel %vm763_vm13, %v738_v20, %v3479_v49  ;;  %v765_v51 = vsel %vm763_vm13, %v748_v31, %v3480_v47  ;;  %3172 = vmatprep.subr.mxu1 %v3584_v0 }
 0x519   : > { %v3355_v52 = vpack.c.bf16 %v765_v51, %v764_v50  ;;  %v787_v53 = vpop.permute.xlu1 %786  ;;  %v3850_v51 = vld [vmem:[%s4098_s1 + $0xf] sm:$0x1] }
 0x51a   : > { %v797_v54 = vsel %vm763_vm13, %v772_v45, %v787_v53  ;;  %v3861_v53 = vld [vmem:[%s4098_s1 + $0xd] sm:$0x1] }
 0x51b   : > { %3356 = vmatpush3.bf16.msra.mxu0 %v3355_v52  ;;  %3173 = vmatpush3.msra.mxu1 %v797_v54  ;;  %v3856_v52 = vld [vmem:[%s4098_s1 + $0xe] sm:$0x1]  ;;  %v3868_v54 = vld [vmem:[%s4098_s1 + $0xc] sm:$0x1] }
 0x51c   : > { %3175 = vmatmul.mubr.msk.f32.vlgmr.msra.gmra.mrb[6].mxu1 %vm884_vm14, %v878_v24  ;;  %3159 = vmatprep.subr.mxu0 %v3584_v0  ;;  %vm1508_vm14 = vcmask 654336  }
 0x51d   : > { %v759_v56 = vpop.permute.xlu1 %758  ;;  %3187 = vmatprep.subr.mxu1 %v3584_v0  ;;  %3189 = vmatprep.mubr.msk.f32.mxu1 %vm3591_vm3, %v3584_v0 }
 0x51e   : > { %v766_v57 = vsel %vm763_vm13, %v750_v55, %v759_v56  ;;  %3188 = vmatpush3.msk.msra.mxu1 %vm1135_vm6, %v3600_v62  ;;  %v1422_v55 = vld [vmem:[%s4098_s1 + $0x17] sm:$0x1] }
 0x51f   : > { %3160 = vmatpush3.msra.mxu0 %v766_v57  ;;  %3363 = vmatprep.subr.bf16.mxu1 %v3595_v46  ;;  %3431 = vpush %v1422_v55 }
 0x520   : > { %3162 = vmatmul.mubr.msk.f32.vlgmr.msra.gmra.mrb[6].mxu0 %vm805_vm15, %v799_v25  ;;  %3177 = vmatprep.subr.mxu0 %v3584_v0  ;;  %vm1429_vm15 = vcmask 392192  }
 0x521   : > { %3179 = vmatprep.mubr.msk.f32.mxu0 %vm3591_vm3, %v3584_v0  ;;  %3178 = vmatpush3.msk.msra.mxu0 %vm971_vm2, %v3600_v62 }
 0x522   : > { %3182 = vmatprep.subr.mxu0 %v3584_v0 }
 0x528   : > { %v882_v41 = vpop.permute.xlu0 %881 }
 0x52e   : > { %v803_v2 = vpop.permute.xlu1 %802 }
 0x550   : > { %s3432_s6 = spop %3431 }
 0x5ef   : > { %v953_v63 = vpop.f32.mrb[6].mxu1 }
 0x5f0   : > { %v954_v48 = vadd.f32 %v953_v63, %v882_v41  ;;  %v3176_v1 = vpop.f32.mrb[7].mxu1 }
 0x5f2   : > { %v958_v4 = vrot.slane %v954_v48, 4 }
 0x5f3   : > { %v874_v3 = vpop.f32.mrb[6].mxu0 }
 0x5f4   : > { %v875_v5 = vadd.f32 %v874_v3, %v803_v2  ;;  %v3163_v6 = vpop.f32.mrb[7].mxu0 }
 0x5f6   : > { %v960_v8 = vsel %vm202_vm7, %v875_v5, %v958_v4 }
 0x5f7   : > { %v966_v9 = vmul.f32 %v964_v7, %v960_v8  ;;  %vm961_vm9 = vcmp.ge.f32.partialorder %v960_v8, 0.0 }
 0x5f9   : > { %v967_v10 = vsel %vm961_vm9, %v960_v8, %v966_v9  ;;  %vm1919_vm9 = vcmask 74768  }
 0x5fa   : > { %1053 = vrot.lane.b32.xlu0 %v967_v10, %s3601_s13  ;;  %3180 = vmatmul.mubr.msk.f32.vlgmr.msra.gmra.mrb[8].mxu0 %vm763_vm13, %v967_v10 }
 0x5fb   : > { %3190 = vmatmul.mubr.msk.f32.vlgmr.msra.gmra.mrb[8].mxu1 %vm763_vm13, %v967_v10  ;;  %3183 = vmatpush3.msk.msra.mxu0 %vm971_vm2, %v3600_v62 }
 0x5fc   : > { %3184 = vmatprep.mubr.msk.f32.mxu0 %vm3591_vm3, %v3584_v0  ;;  %3192 = vmatprep.subr.mxu0 %v3584_v0 }
 0x5fd   : > { %3209 = vmatprep.mubr.msk.f32.mxu1 %vm3591_vm3, %v3584_v0 }
 0x66c   : > { %v1054_v11 = vpop.permute.xlu0 %1053 }
 0x66d   : > { %3185 = vmatmul.mubr.msk.f32.vlgmr.msra.gmra.mrb[10].mxu0 %vm763_vm13, %v1054_v11 }
 0x66e   : > { %3193 = vmatpush3.msk.msra.mxu0 %vm1135_vm6, %v3600_v62  ;;  %3194 = vmatprep.mubr.msk.f32.mxu0 %vm3591_vm3, %v3584_v0 }
 0x66f   : > { %3372 = vmatprep.subr.bf16.mxu0 %v3595_v46 }
 0x671   : > { %3195 = vmatmul.mubr.msk.f32.vlgmr.msra.gmra.mrb[12].mxu0 %vm763_vm13, %v1054_v11 }
 0x672   : > { %3232 = vmatprep.mubr.msk.f32.mxu0 %vm3591_vm3, %v3584_v0 }
 0x6cd   : > { %v1043_v12 = vpop.f32.mrb[8].mxu0 }
 0x6ce   : > { %v1204_v13 = vpop.f32.mrb[8].mxu1  ;;  %v3181_v14 = vpop.f32.mrb[9].mxu0 }
 0x6cf   : > { %v3191_v15 = vpop.f32.mrb[9].mxu1 }
 0x740   : > { %v1123_v16 = vpop.f32.mrb[10].mxu0 }
 0x741   : > { %1128 = vrot.lane.b32.xlu1 %v1123_v16, %s3586_s15  ;;  %v3186_v17 = vpop.f32.mrb[11].mxu0 }
 0x744   : > { %v1279_v18 = vpop.f32.mrb[12].mxu0 }
 0x745   : > { %1048 = vrot.lane.b32.xlu1 %v1043_v12, %s3586_s15  ;;  %1284 = vrot.lane.b32.xlu0 %v1279_v18, %s3586_s15  ;;  %v3196_v19 = vpop.f32.mrb[13].mxu0 }
 0x749   : > { %1209 = vrot.lane.b32.xlu0 %v1204_v13, %s3586_s15 }
 0x7b3   : > { %v1129_v20 = vpop.permute.xlu1 %1128 }
 0x7b4   : > { %1131 = vst.msk [vmem:[#allocation2 + $0x10] sm:$0xff] %vm1051_vm10, %v1129_v20 }
 0x7b5   : > { %1293 = vst.msk [vmem:[#allocation2 + $0x10] sm:$0xff] %vm729_vm11, %v3584_v0 }
 0x7b6   : > { %1295 = vst.msk [vmem:[#allocation2 + $0x10] sm:$0xff] %vm1290_vm12, %v3584_v0 }
 0x7b7   : > { %v1049_v21 = vpop.permute.xlu1 %1048  ;;  %v1285_v22 = vpop.permute.xlu0 %1284 }
 0x7b8   : > { %1052 = vst.msk [vmem:[#allocation2] sm:$0xff] %vm1051_vm10, %v1049_v21  ;;  %1287 = vst.msk [vmem:[#allocation2 + $0x18] sm:$0xff] %vm1051_vm10, %v1285_v22 }
 0x7b9   : > { %1288 = vst.msk [vmem:[#allocation2] sm:$0xff] %vm729_vm11, %v3584_v0  ;;  %1294 = vst.msk [vmem:[#allocation2 + $0x18] sm:$0xff] %vm729_vm11, %v3584_v0 }
 0x7ba   : > { %1291 = vst.msk [vmem:[#allocation2] sm:$0xff] %vm1290_vm12, %v3584_v0  ;;  %1296 = vst.msk [vmem:[#allocation2 + $0x18] sm:$0xff] %vm1290_vm12, %v3584_v0 }
 0x7bb   : > { %v1210_v23 = vpop.permute.xlu0 %1209 }
 0x7bc   : > { %1212 = vst.msk [vmem:[#allocation2 + $0x8] sm:$0xff] %vm1051_vm10, %v1210_v23  ;;  %vm2074_vm10 = vcmask 9216  }
 0x7bd   : > { %1289 = vst.msk [vmem:[#allocation2 + $0x8] sm:$0xff] %vm729_vm11, %v3584_v0  ;;  %v1309_v24 = vld [vmem:[#allocation2 + $0x10] sm:$0xff]  ;;  %vm1353_vm11 = vcmask 31744  }
 0x7be   : > { %1292 = vst.msk [vmem:[#allocation2 + $0x8] sm:$0xff] %vm1290_vm12, %v3584_v0  ;;  %vm2076_vm12 = vcmask 91216  }
 0x7c1   : > { %v1310_v25 = vld [vmem:[#allocation2 + $0x18] sm:$0xff]  ;;  %v1297_v27 = vld [vmem:[#allocation2] sm:$0xff] }
 0x7c2   : > { %v3486_v26 = vpack.i.bf16 %v1310_v25, %v1309_v24 }
 0x7c4   : > { %3487 = vrot.lane.b32.xlu0 %v3486_v26, %s3589_s18  ;;  %3482 = vrot.lane.b32.xlu1 %v3486_v26, %s3587_s16 }
 0x7c5   : > { %v1298_v28 = vld [vmem:[#allocation2 + $0x8] sm:$0xff] }
 0x7c6   : > { %v3501_v29 = vpack.i.bf16 %v1298_v28, %v1297_v27 }
 0x7c8   : > { %3492 = vrot.lane.b32.xlu1 %v3486_v26, %s3588_s17  ;;  %3497 = vrot.lane.b32.xlu0 %v3486_v26, %s3590_s19 }
 0x7cc   : > { %3502 = vrot.lane.b32.xlu1 %v3501_v29, %s3587_s16  ;;  %3507 = vrot.lane.b32.xlu0 %v3501_v29, %s3589_s18 }
 0x7d0   : > { %3512 = vrot.lane.b32.xlu1 %v3486_v26, %s3602_s14 }
 0x836   : > { %v3483_v30 = vpop.permute.xlu1 %3482  ;;  %v3488_v31 = vpop.permute.xlu0 %3487 }
 0x837   : > { %3517 = vrot.lane.b32.xlu0 %v3483_v30, %s3602_s14  ;;  %3532 = vrot.lane.b32.xlu1 %v3488_v31, %s3602_s14 }
 0x83a   : > { %v3493_v32 = vpop.permute.xlu1 %3492  ;;  %v3498_v33 = vpop.permute.xlu0 %3497 }
 0x83b   : > { %3522 = vrot.lane.b32.xlu0 %v3501_v29, %s3588_s17  ;;  %3537 = vrot.lane.b32.xlu1 %v3493_v32, %s3602_s14 }
 0x83e   : > { %v3832_v34 = vpop.permute.xlu1 %3502  ;;  %v3508_v37 = vpop.permute.xlu0 %3507 }
 0x83f   : > { %v3505_v35 = vunpack.i.h.bf16 %v3832_v34  ;;  %v3504_v36 = vunpack.i.l.bf16 %v3832_v34  ;;  %v3510_v38 = vunpack.i.h.bf16 %v3508_v37  ;;  %3527 = vrot.lane.b32.xlu0 %v3501_v29, %s3590_s19  ;;  %3542 = vrot.lane.b32.xlu1 %v3498_v33, %s3602_s14  ;;  %v3509_v43 = vunpack.i.l.bf16 %v3508_v37 }
 0x842   : > { %v3513_v39 = vpop.permute.xlu1 %3512 }
 0x843   : > { %v3515_v44 = vunpack.i.h.bf16 %v3513_v39  ;;  %v3514_v45 = vunpack.i.l.bf16 %v3513_v39  ;;  %3547 = vrot.lane.b32.xlu0 %v3486_v26, %s3603_s20  ;;  %3552 = vrot.lane.b32.xlu1 %v3832_v34, %s3587_s16 }
 0x845   : > { %v1413_v47 = vsel %vm1353_vm11, %v1298_v28, %v3515_v44  ;;  %v1412_v49 = vsel %vm1353_vm11, %v1297_v27, %v3514_v45 }
 0x846   : > { %v3840_v50 = vpack.c.bf16 %v1413_v47, %v1412_v49 }
 0x847   : > { %3562 = vrot.lane.b32.xlu0 %v3483_v30, %s3603_s20  ;;  %3557 = vrot.lane.b32.xlu1 %v3508_v37, %s3587_s16 }
 0x848   : > { %3374 = vmatpush3.bf16.msra.mxu0 %v3840_v50 }
 0x849   : > { %3375 = vmatprep.subr.bf16.mxu0 %v3595_v46 }
 0x84b   : > { %3567 = vrot.lane.b32.xlu0 %v3488_v31, %s3603_s20  ;;  %1673 = vperm.xlu1 %3464, %v3850_v51  }
 0x84f   : > { %1595 = vperm.xlu0 %3465, %v3856_v52   ;;  %1505 = vperm.xlu1 %3464, %v3861_v53  }
 0x853   : > { %1426 = vperm.xlu0 %3465, %v3868_v54  }
 0x8a9   : > { %v3518_v56 = vpop.permute.xlu0 %3517  ;;  %v3533_v57 = vpop.permute.xlu1 %3532 }
 0x8aa   : > { %v3520_v58 = vunpack.i.h.bf16 %v3518_v56  ;;  %v3519_v59 = vunpack.i.l.bf16 %v3518_v56  ;;  %v3535_v60 = vunpack.i.h.bf16 %v3533_v57  ;;  %v3534_v61 = vunpack.i.l.bf16 %v3533_v57 }
 0x8ac   : > { %v1415_v41 = vsel %vm1353_vm11, %v3505_v35, %v3520_v58  ;;  %v1414_v63 = vsel %vm1353_vm11, %v3504_v36, %v3519_v59  ;;  %v1417_v1 = vsel %vm1353_vm11, %v3510_v38, %v3535_v60  ;;  %v1416_v2 = vsel %vm1353_vm11, %v3509_v43, %v3534_v61 }
 0x8ad   : > { %v3880_v48 = vpack.c.bf16 %v1415_v41, %v1414_v63  ;;  %v3523_v3 = vpop.permute.xlu0 %3522  ;;  %v3538_v4 = vpop.permute.xlu1 %3537  ;;  %v3379_v9 = vpack.c.bf16 %v1417_v1, %v1416_v2  ;;  %v1588_v63 = vstv %s3432_s6 }
 0x8ae   : > { %v3525_v5 = vunpack.i.h.bf16 %v3523_v3  ;;  %v3524_v6 = vunpack.i.l.bf16 %v3523_v3  ;;  %v3540_v7 = vunpack.i.h.bf16 %v3538_v4  ;;  %v3539_v8 = vunpack.i.l.bf16 %v3538_v4 }
 0x8af   : > { %3377 = vmatpush3.bf16.msra.mxu0 %v3880_v48 }
 0x8b0   : > { %3378 = vmatprep.subr.bf16.mxu0 %v3595_v46  ;;  %v1419_v10 = vsel %vm1353_vm11, %v3525_v5, %v3540_v7  ;;  %v1418_v11 = vsel %vm1353_vm11, %v3524_v6, %v3539_v8 }
 0x8b1   : > { %v3528_v12 = vpop.permute.xlu0 %3527  ;;  %v3543_v13 = vpop.permute.xlu1 %3542  ;;  %v3382_v18 = vpack.c.bf16 %v1419_v10, %v1418_v11 }
 0x8b2   : > { %v3530_v14 = vunpack.i.h.bf16 %v3528_v12  ;;  %v3529_v15 = vunpack.i.l.bf16 %v3528_v12  ;;  %v3545_v16 = vunpack.i.h.bf16 %v3543_v13  ;;  %v3544_v17 = vunpack.i.l.bf16 %v3543_v13 }
 0x8b3   : > { %3380 = vmatpush3.bf16.msra.mxu0 %v3379_v9 }
 0x8b4   : > { %3381 = vmatprep.subr.bf16.mxu0 %v3595_v46  ;;  %v1421_v21 = vsel %vm1353_vm11, %v3530_v14, %v3545_v16  ;;  %v1420_v22 = vsel %vm1353_vm11, %v3529_v15, %v3544_v17 }
 0x8b5   : > { %v3548_v19 = vpop.permute.xlu0 %3547  ;;  %v3553_v20 = vpop.permute.xlu1 %3552  ;;  %v3385_v29 = vpack.c.bf16 %v1421_v21, %v1420_v22 }
 0x8b6   : > { %v3550_v23 = vunpack.i.h.bf16 %v3548_v19  ;;  %v3549_v24 = vunpack.i.l.bf16 %v3548_v19  ;;  %v3555_v27 = vunpack.i.h.bf16 %v3553_v20  ;;  %v3554_v28 = vunpack.i.l.bf16 %v3553_v20 }
 0x8b7   : > { %3383 = vmatpush3.bf16.msra.mxu0 %v3382_v18 }
 0x8b8   : > { %v1355_v25 = vsel %vm1353_vm11, %v3505_v35, %v3550_v23  ;;  %v1354_v26 = vsel %vm1353_vm11, %v3504_v36, %v3549_v24  ;;  %3384 = vmatprep.subr.bf16.mxu0 %v3595_v46 }
 0x8b9   : > { %v3364_v30 = vpack.c.bf16 %v1355_v25, %v1354_v26  ;;  %v3563_v31 = vpop.permute.xlu0 %3562  ;;  %v3558_v32 = vpop.permute.xlu1 %3557 }
 0x8ba   : > { %v3565_v33 = vunpack.i.h.bf16 %v3563_v31  ;;  %v3564_v37 = vunpack.i.l.bf16 %v3563_v31  ;;  %v3560_v34 = vunpack.i.h.bf16 %v3558_v32  ;;  %v3559_v39 = vunpack.i.l.bf16 %v3558_v32 }
 0x8bb   : > { %3365 = vmatpush3.bf16.msra.mxu1 %v3364_v30  ;;  %3386 = vmatpush3.bf16.msra.mxu0 %v3385_v29 }
 0x8bc   : > { %v1357_v38 = vsel %vm1353_vm11, %v3555_v27, %v3565_v33  ;;  %v1356_v35 = vsel %vm1353_vm11, %v3554_v28, %v3564_v37  ;;  %3366 = vmatprep.subr.bf16.mxu1 %v3595_v46  ;;  %3396 = vmatprep.subr.bf16.mxu0 %v3595_v46 }
 0x8bd   : > { %v3367_v36 = vpack.c.bf16 %v1357_v38, %v1356_v35  ;;  %v3568_v43 = vpop.permute.xlu0 %3567 }
 0x8be   : > { %v3570_v44 = vunpack.i.h.bf16 %v3568_v43  ;;  %v3569_v45 = vunpack.i.l.bf16 %v3568_v43  ;;  %3233 = vmatmul.mubr.msk.f32.vlgmr.msra.gmra.mrb[14].mxu0 %vm1508_vm14, %v3861_v53 }
 0x8bf   : > { %3368 = vmatpush3.bf16.msra.mxu1 %v3367_v36  ;;  %3398 = vmatpush3.bf16.msra.mxu0 %v3840_v50  ;;  %v1755_v50 = vmul.u32 2, %v3684_v42 }
 0x8c0   : > { %v1359_v47 = vsel %vm1353_vm11, %v3560_v34, %v3570_v44  ;;  %v1358_v49 = vsel %vm1353_vm11, %v3559_v39, %v3569_v45  ;;  %3369 = vmatprep.subr.bf16.mxu1 %v3595_v46  ;;  %3399 = vmatprep.subr.bf16.mxu0 %v3595_v46 }
 0x8c1   : > { %v3370_v55 = vpack.c.bf16 %v1359_v47, %v1358_v49  ;;  %3270 = vmatprep.mubr.msk.f32.mxu0 %vm3591_vm3, %v3584_v0  ;;  %v3933_v53 = vadd.s32 1, %v1755_v50  ;;  %vm3946_vm2 = vcmp.eq.s32.totalorder %v3679_v40, %v1755_v50  ;;  %v2392_v49 = vld [vmem:[%s4098_s1 + $0x13] sm:$0x1]  ;;  %v2221_v50 = vld [vmem:[%s4098_s1 + $0x11] sm:$0x1] }
 0x8c2   : > { %v2989_v14 = vsel %vm3946_vm2, 1.0, %v3584_v0 }
 0x8c3   : > { %3371 = vmatpush3.bf16.msra.mxu1 %v3370_v55  ;;  %3401 = vmatpush3.bf16.msra.mxu0 %v3880_v48  ;;  %vm1760_vm0 = vcmp.eq.s32.totalorder %v3679_v40, %v3933_v53 }
 0x8c4   : > { %3387 = vmatprep.subr.bf16.mxu1 %v3595_v46  ;;  %3402 = vmatprep.subr.bf16.mxu0 %v3595_v46 }
 0x8c6   : > { %3210 = vmatmul.mubr.msk.f32.vlgmr.msra.gmra.mrb[10].mxu1 %vm1429_vm15, %v3868_v54 }
 0x8c7   : > { %3389 = vmatpush3.bf16.msra.mxu1 %v3364_v30  ;;  %3404 = vmatpush3.bf16.msra.mxu0 %v3379_v9 }
 0x8c8   : > { %3390 = vmatprep.subr.bf16.mxu1 %v3595_v46  ;;  %3405 = vmatprep.subr.bf16.mxu0 %v3595_v46 }
 0x8c9   : > { %3247 = vmatprep.mubr.msk.f32.mxu1 %vm3591_vm3, %v3584_v0 }
 0x8cb   : > { %3392 = vmatpush3.bf16.msra.mxu1 %v3367_v36  ;;  %3407 = vmatpush3.bf16.msra.mxu0 %v3382_v18 }
 0x8cc   : > { %3393 = vmatprep.subr.bf16.mxu1 %v3595_v46  ;;  %3408 = vmatprep.subr.bf16.mxu0 %v3595_v46 }
 0x8ce   : > { %v1596_v57 = vpop.permute.xlu0 %1595 }
 0x8cf   : > { %3395 = vmatpush3.bf16.msra.mxu1 %v3370_v55  ;;  %3410 = vmatpush3.bf16.msra.mxu0 %v3385_v29  ;;  %v2314_v55 = vld [vmem:[%s4098_s1 + $0x12] sm:$0x1] }
 0x8d0   : > { %3273 = vmatprep.subr.mxu1 %v3584_v0  ;;  %3411 = vmatprep.subr.bf16.mxu0 %v3595_v46 }
 0x8d2   : > { %3248 = vmatmul.mubr.msk.f32.vlgmr.msra.gmra.mrb[12].mxu1 %vm1429_vm15, %v3856_v52  ;;  %3271 = vmatmul.mubr.msk.f32.vlgmr.msra.gmra.mrb[16].mxu0 %vm1508_vm14, %v3850_v51  ;;  %v2990_v52 = vsel %vm1760_vm0, 1.0, %v3584_v0  ;;  %v1674_v51 = vpop.permute.xlu1 %1673  ;;  %v1427_v59 = vpop.permute.xlu0 %1426  ;;  %vm3604_vm14 = vmmov 1  }
 0x8d3   : > { %3275 = vmatprep.mubr.msk.f32.mxu1 %vm3591_vm3, %v3584_v0  ;;  %3302 = vmatprep.mubr.msk.f32.mxu0 %vm3591_vm3, %v3584_v0  ;;  %vm3413_vm15 = vmpackc.low %vm168_vm5, %vm3604_vm14 }
 0x8d4   : > { %3274 = vmatpush3.msk.msra.mxu1 %vm202_vm7, %v2990_v52 }
 0x8d5   : > { %3278 = vmatprep.subr.mxu1 %v3584_v0 }
 0x8d6   : > { %v1506_v58 = vpop.permute.xlu1 %1505 }
 0x991   : > { %v1577_v54 = vpop.f32.mrb[14].mxu0 }
 0x992   : > { %v3234_v56 = vpop.f32.mrb[15].mxu0  ;;  %v1578_v42 = vadd.f32 %v1577_v54, %v1506_v58 }
 0x994   : > { %v1582_v61 = vrot.slane %v1578_v42, 7 }
 0x999   : > { %v1498_v60 = vpop.f32.mrb[10].mxu1 }
 0x99a   : > { %v1499_v41 = vadd.f32 %v1498_v60, %v1427_v59  ;;  %v3211_v48 = vpop.f32.mrb[11].mxu1 }
 0x99c   : > { %v1584_v1 = vsel %vm166_vm4, %v1499_v41, %v1582_v61 }
 0x99d   : > { %v1590_v2 = vmul.f32 %v1588_v63, %v1584_v1  ;;  %vm1585_vm1 = vcmp.ge.f32.partialorder %v1584_v1, 0.0 }
 0x99f   : > { %v1591_v3 = vsel %vm1585_vm1, %v1584_v1, %v1590_v2  ;;  %vm2145_vm1 = vcmask 48128  }
 0x9a0   : > { %1995 = vrot.lane.b32.xlu0 %v1591_v3, %s3590_s19 }
 0x9a5   : > { %v1666_v4 = vpop.f32.mrb[12].mxu1  ;;  %v1744_v5 = vpop.f32.mrb[16].mxu0 }
 0x9a6   : > { %v1745_v6 = vadd.f32 %v1744_v5, %v1674_v51  ;;  %v3272_v7 = vpop.f32.mrb[17].mxu0  ;;  %v3249_v8 = vpop.f32.mrb[13].mxu1  ;;  %v1667_v9 = vadd.f32 %v1666_v4, %v1596_v57  ;;  %v2138_v51 = vld [vmem:[%s4098_s1 + $0x18] sm:$0x1] }
 0x9a7   : > { %3433 = vpush %v2138_v51 }
 0x9a8   : > { %v1749_v10 = vrot.slane %v1745_v6, 7 }
 0x9aa   : > { %v1751_v12 = vsel %vm166_vm4, %v1667_v9, %v1749_v10 }
 0x9ab   : > { %vm1752_vm6 = vcmp.ge.f32.partialorder %v1751_v12, 0.0  ;;  %v1753_v13 = vmul.f32 %v1751_v12, %v1588_v63 }
 0x9ad   : > { %v1754_v15 = vsel %vm1752_vm6, %v1751_v12, %v1753_v13  ;;  %vm2227_vm6 = vcmask 80896  }
 0x9ae   : > { %1921 = vrot.lane.b32.xlu1 %v1754_v15, %s3590_s19  ;;  %3276 = vmatmul.mubr.msk.f32.vlgmr.msra.gmra.mrb[14].mxu1 %vm1353_vm11, %v1754_v15 }
 0x9af   : > { %3279 = vmatpush3.msk.msra.mxu1 %vm202_vm7, %v2989_v14  ;;  %3280 = vmatprep.mubr.msk.f32.mxu1 %vm3591_vm3, %v3584_v0 }
 0x9b0   : > { %3283 = vmatprep.subr.mxu1 %v3584_v0 }
 0x9b6   : > { %3281 = vmatmul.mubr.msk.f32.vlgmr.msra.gmra.mrb[14].mxu1 %vm1353_vm11, %v1591_v3 }
 0x9b7   : > { %3284 = vmatpush3.msk.msra.mxu1 %vm202_vm7, %v2990_v52  ;;  %3285 = vmatprep.mubr.msk.f32.mxu1 %vm3591_vm3, %v3584_v0  ;;  %v2139_v52 = vld [vmem:[%s4098_s1 + $0x10] sm:$0x1] }
 0x9b8   : > { %3288 = vmatprep.subr.mxu1 %v3584_v0 }
 0x9d8   : > { %s3434_s21 = spop %3433 }
 0xa12   : > { %v1996_v17 = vpop.permute.xlu0 %1995 }
 0xa20   : > { %v1922_v16 = vpop.permute.xlu1 %1921 }
 0xa21   : > { %3286 = vmatmul.mubr.msk.f32.vlgmr.msra.gmra.mrb[16].mxu1 %vm1353_vm11, %v1922_v16 }
 0xa22   : > { %3289 = vmatpush3.msk.msra.mxu1 %vm202_vm7, %v2989_v14  ;;  %3290 = vmatprep.mubr.msk.f32.mxu1 %vm3591_vm3, %v3584_v0  ;;  %v2310_v14 = vstv %s3434_s21 }
 0xa23   : > { %3293 = vmatprep.subr.mxu1 %v3584_v0 }
 0xa29   : > { %3291 = vmatmul.mubr.msk.f32.vlgmr.msra.gmra.mrb[16].mxu1 %vm1353_vm11, %v1996_v17  ;;  %vm2120_vm11 = vcmask 1045504  }
 0xa2a   : > { %3295 = vmatprep.mubr.msk.f32.mxu1 %vm3591_vm3, %v3584_v0 }
 0xa89   : > { %v1911_v18 = vpop.f32.mrb[14].mxu1 }
 0xa8a   : > { %1916 = vrot.lane.b32.xlu0 %v1911_v18, %s3586_s15  ;;  %v3282_v19 = vpop.f32.mrb[15].mxu1 }
 0xafc   : > { %v1917_v20 = vpop.permute.xlu0 %1916  ;;  %v2065_v21 = vpop.f32.mrb[16].mxu1 }
 0xafd   : > { %1920 = vst.msk [vmem:[#allocation2] sm:$0x3] %vm1919_vm9, %v1917_v20  ;;  %2070 = vrot.lane.b32.xlu1 %v2065_v21, %s3586_s15  ;;  %v3292_v22 = vpop.f32.mrb[17].mxu1 }
 0xafe   : > { %2075 = vst.msk [vmem:[#allocation2] sm:$0x3] %vm2074_vm10, %v3584_v0 }
 0xaff   : > { %2077 = vst.msk [vmem:[#allocation2] sm:$0x3] %vm2076_vm12, %v3584_v0 }
 0xb06   : > { %v2080_v28 = vld [vmem:[#allocation2] sm:$0x3] }
 0xb07   : > { %v2082_v29 = vrot.slane %v2080_v28, 6  ;;  %v2086_v30 = vrot.slane %v2080_v28, 4  ;;  %v2113_v31 = vrot.slane %v2080_v28, 2 }
 0xb6f   : > { %v2071_v23 = vpop.permute.xlu1 %2070 }
 0xb70   : > { %2073 = vst.msk [vmem:[#allocation2 + $0x10] sm:$0x3] %vm1919_vm9, %v2071_v23 }
 0xb71   : > { %2078 = vst.msk [vmem:[#allocation2 + $0x10] sm:$0x3] %vm2074_vm10, %v3584_v0 }
 0xb72   : > { %2079 = vst.msk [vmem:[#allocation2 + $0x10] sm:$0x3] %vm2076_vm12, %v3584_v0  ;;  %vm2783_vm12 = vcmask 156816  }
 0xb79   : > { %v2092_v24 = vld [vmem:[#allocation2 + $0x10] sm:$0x3] }
 0xb7a   : > { %v2094_v25 = vrot.slane %v2092_v24, 6  ;;  %v2098_v26 = vrot.slane %v2092_v24, 4  ;;  %v2122_v27 = vrot.slane %v2092_v24, 2 }
 0xb7c   : > { %2095 = vrot.lane.b32.xlu1 %v2094_v25, %s3587_s16  ;;  %2099 = vrot.lane.b32.xlu0 %v2098_v26, %s3589_s18 }
 0xb80   : > { %2123 = vrot.lane.b32.xlu1 %v2122_v27, %s3588_s17  ;;  %2126 = vrot.lane.b32.xlu0 %v2092_v24, %s3590_s19 }
 0xb84   : > { %2083 = vrot.lane.b32.xlu1 %v2082_v29, %s3587_s16  ;;  %2087 = vrot.lane.b32.xlu0 %v2086_v30, %s3589_s18 }
 0xb88   : > { %2114 = vrot.lane.b32.xlu1 %v2113_v31, %s3588_s17  ;;  %2117 = vrot.lane.b32.xlu0 %v2080_v28, %s3590_s19 }
 0xbee   : > { %v2096_v32 = vpop.permute.xlu1 %2095  ;;  %v2100_v33 = vpop.permute.xlu0 %2099 }
 0xbef   : > { %v2102_v37 = vsel %vm168_vm5, %v2092_v24, %v2096_v32 }
 0xbf0   : > { %v2103_v38 = vsel %vm202_vm7, %v2102_v37, %v2100_v33 }
 0xbf2   : > { %v2124_v35 = vpop.permute.xlu1 %2123  ;;  %v2127_v34 = vpop.permute.xlu0 %2126 }
 0xbf3   : > { %v2128_v39 = vsel %vm2120_vm11, %v2103_v38, %v2124_v35 }
 0xbf4   : > { %v3571_v36 = vpack.i.bf16 %v2127_v34, %v2128_v39 }
 0xbf6   : > { %3572 = vrot.lane.b32.xlu1 %v3571_v36, %s3598_s30  ;;  %v2084_v43 = vpop.permute.xlu1 %2083  ;;  %v2088_v44 = vpop.permute.xlu0 %2087 }
 0xbf7   : > { %v2090_v45 = vsel %vm168_vm5, %v2080_v28, %v2084_v43 }
 0xbf8   : > { %v2091_v47 = vsel %vm202_vm7, %v2090_v45, %v2088_v44 }
 0xbf9   : > { %2105 = vrot.lane.b32.xlu0 %v2091_v47, %s3587_s16 }
 0xbfa   : > { %2109 = vrot.lane.b32.xlu1 %v2103_v38, %s3599_s3  ;;  %v2115_v54 = vpop.permute.xlu1 %2114  ;;  %v2118_v56 = vpop.permute.xlu0 %2117 }
 0xbfb   : > { %v2121_v59 = vsel %vm2120_vm11, %v2091_v47, %v2115_v54 }
 0xbfd   : > { %2395 = vperm.xlu0 %3465, %v2392_v49  }
 0xbfe   : > { %2317 = vperm.xlu1 %3464, %v2314_v55  }
 0xc01   : > { %2224 = vperm.xlu0 %3465, %v2221_v50  }
 0xc02   : > { %2142 = vperm.xlu1 %3464, %v2139_v52  }
 0xc68   : > { %v3573_v57 = vpop.permute.xlu1 %3572 }
 0xc69   : > { %v3575_v58 = vunpack.i.h.bf16 %v3573_v57  ;;  %v3574_v42 = vunpack.i.l.bf16 %v3573_v57 }
 0xc6b   : > { %v2137_v60 = vsel %vm763_vm13, %v2118_v56, %v3575_v58  ;;  %v2136_v61 = vsel %vm763_vm13, %v2121_v59, %v3574_v42  ;;  %v2106_v41 = vpop.permute.xlu0 %2105 }
 0xc6c   : > { %v3412_v63 = vpack.c.bf16 %v2137_v60, %v2136_v61  ;;  %v2110_v48 = vpop.permute.xlu1 %2109 }
 0xc6d   : > { %v2112_v1 = vsel %vm763_vm13, %v2106_v41, %v2110_v48 }
 0xc6e   : > { %3294 = vmatpush3.msk.msra.mxu1 %vm2120_vm11, %v2112_v1  ;;  %3414 = vmatpush3.bf16.msk.msra.mxu0 %vm3413_vm15, %v3412_v63 }
 0xc6f   : > { %3296 = vmatmul.mubr.msk.f32.vlgmr.msra.gmra.mrb[18].mxu1 %vm2145_vm1, %v2139_v52  ;;  %3305 = vmatprep.subr.mxu1 %v3584_v0 }
 0xc70   : > { %3306 = vmatpush3.msk.msra.mxu1 %vm2120_vm11, %v2112_v1  ;;  %3415 = vmatprep.subr.bf16.mxu0 %v3595_v46 }
 0xc71   : > { %3303 = vmatmul.mubr.msk.f32.vlgmr.msra.gmra.mrb[18].mxu0 %vm2227_vm6, %v2221_v50  ;;  %3307 = vmatprep.mubr.msk.f32.mxu1 %vm3591_vm3, %v3584_v0 }
 0xc72   : > { %3418 = vmatpush3.bf16.msk.msra.mxu0 %vm3413_vm15, %v3412_v63  ;;  %3314 = vmatprep.mubr.msk.f32.mxu0 %vm3591_vm3, %v3584_v0 }
 0xc73   : > { %3308 = vmatmul.mubr.msk.f32.vlgmr.msra.gmra.mrb[20].mxu1 %vm2145_vm1, %v2314_v55  ;;  %3317 = vmatprep.subr.mxu1 %v3584_v0 }
 0xc74   : > { %3318 = vmatpush3.msk.msra.mxu1 %vm1760_vm0, %v3600_v62  ;;  %3319 = vmatprep.mubr.msk.f32.mxu1 %vm3591_vm3, %v3584_v0 }
 0xc75   : > { %3315 = vmatmul.mubr.msk.f32.vlgmr.msra.gmra.mrb[20].mxu0 %vm2227_vm6, %v2392_v49  ;;  %3322 = vmatprep.subr.mxu1 %v3584_v0 }
 0xc76   : > { %3327 = vmatprep.subr.mxu0 %v3584_v0  ;;  %3329 = vmatprep.mubr.msk.f32.mxu0 %vm3591_vm3, %v3584_v0 }
 0xc77   : > { %3328 = vmatpush3.msk.msra.mxu0 %vm1760_vm0, %v3600_v62 }
 0xc78   : > { %3332 = vmatprep.subr.mxu0 %v3584_v0 }
 0xc7c   : > { %v2396_v46 = vpop.permute.xlu0 %2395 }
 0xc7d   : > { %v2318_v2 = vpop.permute.xlu1 %2317 }
 0xc80   : > { %v2225_v5 = vpop.permute.xlu0 %2224 }
 0xc81   : > { %v2143_v9 = vpop.permute.xlu1 %2142 }
 0xd42   : > { %v2217_v3 = vpop.f32.mrb[18].mxu1 }
 0xd43   : > { %v3297_v4 = vpop.f32.mrb[19].mxu1  ;;  %v2218_v12 = vadd.f32 %v2217_v3, %v2143_v9 }
 0xd44   : > { %v2299_v6 = vpop.f32.mrb[18].mxu0 }
 0xd45   : > { %v2300_v7 = vadd.f32 %v2299_v6, %v2225_v5  ;;  %v3304_v8 = vpop.f32.mrb[19].mxu0 }
 0xd46   : > { %v2388_v10 = vpop.f32.mrb[20].mxu1 }
 0xd47   : > { %v2304_v13 = vrot.slane %v2300_v7, 7  ;;  %v3309_v15 = vpop.f32.mrb[21].mxu1  ;;  %v2389_v19 = vadd.f32 %v2388_v10, %v2318_v2 }
 0xd48   : > { %v2466_v16 = vpop.f32.mrb[20].mxu0 }
 0xd49   : > { %v2306_v40 = vsel %vm166_vm4, %v2218_v12, %v2304_v13  ;;  %v2467_v53 = vadd.f32 %v2466_v16, %v2396_v46  ;;  %v3316_v17 = vpop.f32.mrb[21].mxu0 }
 0xd4a   : > { %v2312_v18 = vmul.f32 %v2310_v14, %v2306_v40  ;;  %vm2307_vm0 = vcmp.ge.f32.partialorder %v2306_v40, 0.0 }
 0xd4b   : > { %v2471_v20 = vrot.slane %v2467_v53, 7 }
 0xd4c   : > { %v2313_v21 = vsel %vm2307_vm0, %v2306_v40, %v2312_v18 }
 0xd4d   : > { %2703 = vrot.lane.b32.xlu1 %v2313_v21, %s3601_s13  ;;  %v2473_v22 = vsel %vm166_vm4, %v2389_v19, %v2471_v20  ;;  %vm2627_vm4 = vcmask 140304  }
 0xd4e   : > { %vm2474_vm9 = vcmp.ge.f32.partialorder %v2473_v22, 0.0  ;;  %v2475_v23 = vmul.f32 %v2473_v22, %v2310_v14 }
 0xd50   : > { %v2476_v24 = vsel %vm2474_vm9, %v2473_v22, %v2475_v23 }
 0xd51   : > { %2629 = vrot.lane.b32.xlu0 %v2476_v24, %s3601_s13  ;;  %3320 = vmatmul.mubr.msk.f32.vlgmr.msra.gmra.mrb[22].mxu1 %vm763_vm13, %v2476_v24 }
 0xd52   : > { %3323 = vmatpush3.msk.msra.mxu1 %vm3946_vm2, %v3600_v62  ;;  %3324 = vmatprep.mubr.msk.f32.mxu1 %vm3591_vm3, %v3584_v0 }
 0xd53   : > { %3337 = vmatprep.subr.mxu1 %v3584_v0 }
 0xd59   : > { %3325 = vmatmul.mubr.msk.f32.vlgmr.msra.gmra.mrb[22].mxu1 %vm763_vm13, %v2313_v21 }
 0xd5a   : > { %3339 = vmatprep.mubr.msk.f32.mxu1 %vm3591_vm3, %v3584_v0 }
 0xdbf   : > { %v2704_v26 = vpop.permute.xlu1 %2703 }
 0xdc3   : > { %v2630_v25 = vpop.permute.xlu0 %2629 }
 0xdc4   : > { %3330 = vmatmul.mubr.msk.f32.vlgmr.msra.gmra.mrb[22].mxu0 %vm763_vm13, %v2630_v25 }
 0xdc5   : > { %3333 = vmatpush3.msk.msra.mxu0 %vm3946_vm2, %v3600_v62  ;;  %3334 = vmatprep.mubr.msk.f32.mxu0 %vm3591_vm3, %v3584_v0  ;;  %vm2901_vm3 = vcmask 253952  }
 0xdcc   : > { %3335 = vmatmul.mubr.msk.f32.vlgmr.msra.gmra.mrb[22].mxu0 %vm763_vm13, %v2704_v26 }
 0xe2c   : > { %v2619_v27 = vpop.f32.mrb[22].mxu1 }
 0xe2d   : > { %2624 = vrot.lane.b32.xlu0 %v2619_v27, %s3586_s15  ;;  %v3326_v28 = vpop.f32.mrb[23].mxu1 }
 0xe9f   : > { %v2625_v29 = vpop.permute.xlu0 %2624  ;;  %v2773_v30 = vpop.f32.mrb[22].mxu0 }
 0xea0   : > { %2628 = vst.msk [vmem:[#allocation2] sm:$0x3] %vm2627_vm4, %v2625_v29  ;;  %2778 = vrot.lane.b32.xlu1 %v2773_v30, %s3586_s15  ;;  %v3336_v31 = vpop.f32.mrb[23].mxu0 }
 0xea1   : > { %2782 = vst.msk [vmem:[#allocation2] sm:$0x3] %vm2074_vm10, %v3584_v0 }
 0xea2   : > { %2784 = vst.msk [vmem:[#allocation2] sm:$0x3] %vm2783_vm12, %v3584_v0 }
 0xea9   : > { %v2787_v62 = vld [vmem:[#allocation2] sm:$0x3] }
 0xeaa   : > { %v2789_v11 = vrot.slane %v2787_v62, 6  ;;  %v2793_v32 = vrot.slane %v2787_v62, 4 }
 0xeac   : > { %2790 = vrot.lane.b32.xlu0 %v2789_v11, %s3587_s16 }
 0xeb0   : > { %2794 = vrot.lane.b32.xlu0 %v2793_v32, %s3589_s18 }
 0xf12   : > { %v2779_v33 = vpop.permute.xlu1 %2778 }
 0xf13   : > { %2781 = vst.msk [vmem:[#allocation2 + $0x10] sm:$0x3] %vm2627_vm4, %v2779_v33 }
 0xf14   : > { %2785 = vst.msk [vmem:[#allocation2 + $0x10] sm:$0x3] %vm2074_vm10, %v3584_v0 }
 0xf15   : > { %2786 = vst.msk [vmem:[#allocation2 + $0x10] sm:$0x3] %vm2783_vm12, %v3584_v0  ;;  %v2820_v0 = vld [vmem:[%s4098_s1 + $0x14] sm:$0x1] }
 0xf1c   : > { %v2799_v37 = vld [vmem:[#allocation2 + $0x10] sm:$0x3] }
 0xf1d   : > { %v2801_v38 = vrot.slane %v2799_v37, 6  ;;  %v2805_v34 = vrot.slane %v2799_v37, 4 }
 0xf1e   : > { %v2791_v35 = vpop.permute.xlu0 %2790 }
 0xf1f   : > { %2802 = vrot.lane.b32.xlu1 %v2801_v38, %s3587_s16  ;;  %v2797_v39 = vsel %vm168_vm5, %v2787_v62, %v2791_v35 }
 0xf22   : > { %v2795_v36 = vpop.permute.xlu0 %2794 }
 0xf23   : > { %2806 = vrot.lane.b32.xlu1 %v2805_v34, %s3589_s18  ;;  %v2798_v43 = vsel %vm202_vm7, %v2797_v39, %v2795_v36 }
 0xf24   : > { %2812 = vrot.lane.b32.xlu0 %v2798_v43, %s3587_s16 }
 0xf28   : > { %2823 = vperm.xlu0 %3465, %v2820_v0  }
 0xf91   : > { %v2803_v44 = vpop.permute.xlu1 %2802 }
 0xf92   : > { %v2809_v45 = vsel %vm168_vm5, %v2799_v37, %v2803_v44 }
 0xf95   : > { %v2807_v47 = vpop.permute.xlu1 %2806 }
 0xf96   : > { %v2810_v49 = vsel %vm202_vm7, %v2809_v45, %v2807_v47  ;;  %v2813_v55 = vpop.permute.xlu0 %2812 }
 0xf97   : > { %2816 = vrot.lane.b32.xlu1 %v2810_v49, %s3594_s23 }
 0xfa7   : > { %v2824_v51 = vpop.permute.xlu0 %2823 }
0x1009   : > { %v2817_v50 = vpop.permute.xlu1 %2816 }
0x100a   : > { %v2819_v52 = vsel %vm190_vm8, %v2813_v55, %v2817_v50 }
0x100b   : > { %3338 = vmatpush3.msk.msra.mxu1 %vm2120_vm11, %v2819_v52 }
0x100c   : > { %3340 = vmatmul.mubr.msk.f32.vlgmr.msra.gmra.mrb[24].mxu1 %vm2145_vm1, %v2820_v0 }
0x10df   : > { %v2897_v54 = vpop.f32.mrb[24].mxu1 }
0x10e0   : > { %v2898_v56 = vadd.f32 %v2897_v54, %v2824_v51  ;;  %v3341_v57 = vpop.f32.mrb[25].mxu1 }
0x10e2   : > { %2902 = vst.msk [vmem:[%s133_s22] sm:$0x1] %vm2901_vm3, %v2898_v56 }
0x10e3 PF: > { %s12_s9 = sadd.s32 1, %s3582_s9  }
0x10e4   : > { %p9_p4 = scmp.ge.s32.totalorder %s12_s9, 4  }
0x10e6   :  { %11 = sbr.rel (!%p9_p4) target bundleno = 1 (0x1), region = 59 }

</bundles_post_ra>
